<compile_context>
chip_gen: v6e
topology: v6e:2x2x1
jax: 0.10.0
libtpu: 0.0.40
codegen_flags: <defaults>
</compile_context>

<pallas_src>
import math
import functools

import jax
import jax.numpy as jnp
from jax import lax
from jax.experimental import pallas as pl
from jax.experimental.pallas import tpu as pltpu

_VMEM_LIMIT = 48 * 1024 * 1024   # explicit scoped-VMEM limit (safe on v5e/v6e/v7x)
_LN_EPS = 1e-5                   # nn.LayerNorm default


# ------------------------------------------------------------------ helpers

def _row_tile(M, cap=512):
    """Largest multiple-of-8 divisor of M (<= cap); fall back to full M."""
    best = None
    b = 8
    while b <= min(M, cap):
        if M % b == 0:
            best = b
        b += 8
    return best if best is not None else M


def _col_tile(N, cap=512):
    """Largest multiple-of-128 divisor of N (<= cap); fall back to full N."""
    best = None
    b = 128
    while b <= min(N, cap):
        if N % b == 0:
            best = b
        b += 128
    return best if best is not None else N


def _layernorm_f32(x, g, b):
    mean = jnp.mean(x, axis=-1, keepdims=True)
    var = jnp.mean((x - mean) ** 2, axis=-1, keepdims=True)
    return (x - mean) * lax.rsqrt(var + _LN_EPS) * g + b


# ------------------------------------------------------------------ kernels

def _ln_qkv_kernel(x_ref, g_ref, b_ref, wq_ref, bq_ref, wkv_ref, bkv_ref,
                   q_ref, kv_ref):
    """Q = LN(x) @ Wq + bq ; KV = LN(x) @ Wkv + bkv   (bf16 outputs)."""
    xn = _layernorm_f32(x_ref[...], g_ref[...], b_ref[...]).astype(jnp.bfloat16)
    q_ref[...] = (jnp.dot(xn, wq_ref[...], preferred_element_type=jnp.float32)
                  + bq_ref[...]).astype(jnp.bfloat16)
    kv_ref[...] = (jnp.dot(xn, wkv_ref[...], preferred_element_type=jnp.float32)
                   + bkv_ref[...]).astype(jnp.bfloat16)


def _attn_kernel(q_ref, kv_ref, mask_ref, res_ref, wo_ref, bo_ref, o_ref,
                 *, num_heads, d_model):
    """Per (batch, q-tile): MHA + output projection + residual (bf16 out)."""
    dk = d_model // num_heads
    scale = 1.0 / math.sqrt(dk)
    q = q_ref[...]                       # (tq, D)  bf16
    kv = kv_ref[...]                     # (T, 2D)  bf16
    mask = mask_ref[...]                 # (tq, T)  f32 additive
    wo = wo_ref[...]                     # (D, D)   bf16

    acc = jnp.zeros(o_ref.shape, jnp.float32)
    for h in range(num_heads):           # static unroll over heads
        lo, hi = h * dk, (h + 1) * dk
        qh = q[:, lo:hi]
        kh = kv[:, lo:hi]
        vh = kv[:, d_model + lo:d_model + hi]
        # scores: contract over dk without materializing a K transpose
        s = lax.dot_general(qh, kh, (((1,), (1,)), ((), ())),
                            preferred_element_type=jnp.float32) * scale + mask
        s = s - jnp.max(s, axis=-1, keepdims=True)
        p = jnp.exp(s)
        p = p * pl.reciprocal(jnp.sum(p, axis=-1, keepdims=True), approx=True)
        hv = jnp.dot(p.astype(jnp.bfloat16), vh,
                     preferred_element_type=jnp.float32)            # (tq, dk)
        # attn @ Wo == sum_h head_h @ Wo[h*dk:(h+1)*dk, :] -> no concat
        acc = acc + jnp.dot(hv.astype(jnp.bfloat16), wo[lo:hi, :],
                            preferred_element_type=jnp.float32)
    o_ref[...] = (acc + bo_ref[...] + res_ref[...]).astype(o_ref.dtype)


def _ln_ffn_kernel(x_ref, g_ref, b_ref, w1_ref, b1_ref, w2_ref, b2_ref,
                   o_ref, xn_ref, acc_ref):
    """x + W2 @ relu(W1 @ LN(x) + b1) + b2, K-accumulated over F tiles."""
    k = pl.program_id(1)

    @pl.when(k == 0)
    def _():
        xn = _layernorm_f32(x_ref[...].astype(jnp.float32),
                            g_ref[...], b_ref[...])
        xn_ref[...] = xn.astype(jnp.bfloat16)
        acc_ref[...] = jnp.zeros_like(acc_ref)

    h = (jnp.dot(xn_ref[...], w1_ref[...], preferred_element_type=jnp.float32)
         + b1_ref[...])
    h = jnp.maximum(h, 0.0)                                          # ReLU
    acc_ref[...] += jnp.dot(h.astype(jnp.bfloat16), w2_ref[...],
                            preferred_element_type=jnp.float32)

    @pl.when(k == pl.num_programs(1) - 1)
    def _():
        o_ref[...] = (acc_ref[...] + b2_ref[...]
                      + x_ref[...].astype(jnp.float32)).astype(o_ref.dtype)


# ------------------------------------------------------------------ wrappers

def ln_qkv(x2d, g, b, wq, bq, wkv, bkv):
    M, D = x2d.shape
    bm = _row_tile(M)
    return pl.pallas_call(
        _ln_qkv_kernel,
        out_shape=(jax.ShapeDtypeStruct((M, D), jnp.bfloat16),
                   jax.ShapeDtypeStruct((M, 2 * D), jnp.bfloat16)),
        grid=(M // bm,),
        in_specs=[pl.BlockSpec((bm, D), lambda i: (i, 0)),
                  pl.BlockSpec((1, D), lambda i: (0, 0)),
                  pl.BlockSpec((1, D), lambda i: (0, 0)),
                  pl.BlockSpec((D, D), lambda i: (0, 0)),
                  pl.BlockSpec((1, D), lambda i: (0, 0)),
                  pl.BlockSpec((D, 2 * D), lambda i: (0, 0)),
                  pl.BlockSpec((1, 2 * D), lambda i: (0, 0))],
        out_specs=(pl.BlockSpec((bm, D), lambda i: (i, 0)),
                   pl.BlockSpec((bm, 2 * D), lambda i: (i, 0))),
        compiler_params=pltpu.CompilerParams(
            dimension_semantics=("parallel",),
            vmem_limit_bytes=_VMEM_LIMIT),
    )(x2d, g, b, wq, bq, wkv, bkv)


def attn_out_residual(q, kv, mask2d, x_res2d, wo, bo, B, T, num_heads):
    M, D = q.shape
    tq = _row_tile(T, cap=256)
    nq = T // tq
    kern = functools.partial(_attn_kernel, num_heads=num_heads, d_model=D)
    return pl.pallas_call(
        kern,
        out_shape=jax.ShapeDtypeStruct((M, D), jnp.bfloat16),
        grid=(B, nq),
        in_specs=[pl.BlockSpec((tq, D), lambda b, qi: (b * nq + qi, 0)),
                  pl.BlockSpec((T, 2 * D), lambda b, qi: (b, 0)),
                  pl.BlockSpec((tq, T), lambda b, qi: (qi, 0)),   # shared mask
                  pl.BlockSpec((tq, D), lambda b, qi: (b * nq + qi, 0)),
                  pl.BlockSpec((D, D), lambda b, qi: (0, 0)),
                  pl.BlockSpec((1, D), lambda b, qi: (0, 0))],
        out_specs=pl.BlockSpec((tq, D), lambda b, qi: (b * nq + qi, 0)),
        compiler_params=pltpu.CompilerParams(
            dimension_semantics=("parallel", "parallel"),
            vmem_limit_bytes=_VMEM_LIMIT),
    )(q, kv, mask2d, x_res2d, wo, bo)


def ln_ffn_residual(x2d, g, b, w1, b1, w2, b2):
    M, D = x2d.shape
    F = w1.shape[1]
    bm = _row_tile(M)
    bf = _col_tile(F)
    return pl.pallas_call(
        _ln_ffn_kernel,
        out_shape=jax.ShapeDtypeStruct((M, D), jnp.float32),
        grid=(M // bm, F // bf),
        in_specs=[pl.BlockSpec((bm, D), lambda i, k: (i, 0)),
                  pl.BlockSpec((1, D), lambda i, k: (0, 0)),
                  pl.BlockSpec((1, D), lambda i, k: (0, 0)),
                  pl.BlockSpec((D, bf), lambda i, k: (0, k)),
                  pl.BlockSpec((1, bf), lambda i, k: (0, k)),
                  pl.BlockSpec((bf, D), lambda i, k: (k, 0)),
                  pl.BlockSpec((1, D), lambda i, k: (0, 0))],
        out_specs=pl.BlockSpec((bm, D), lambda i, k: (i, 0)),
        scratch_shapes=[pltpu.VMEM((bm, D), jnp.bfloat16),   # cached LN(x)
                        pltpu.VMEM((bm, D), jnp.float32)],   # f32 accumulator
        compiler_params=pltpu.CompilerParams(
            dimension_semantics=("parallel", "arbitrary"),
            vmem_limit_bytes=_VMEM_LIMIT),
    )(x2d, g, b, w1, b1, w2, b2)


# ------------------------------------------------------------------ forward

def encoder_layer_fwd(x, mask_add2d, p, num_heads):
    """x = x + SelfAttn(LN1(x), mask);  x = x + FFN(LN2(x)).  Dropout = identity."""
    B, T, D = x.shape
    x2d = x.reshape(B * T, D)
    q, kv = ln_qkv(x2d, p["ln1_g"], p["ln1_b"],
                   p["wq"], p["bq"], p["wkv"], p["bkv"])
    x2d = attn_out_residual(q, kv, mask_add2d, x2d, p["wo"], p["bo"],
                            B, T, num_heads)                    # bf16 residual stream
    x2d = ln_ffn_residual(x2d, p["ln2_g"], p["ln2_b"],
                          p["ffn_w1"], p["ffn_b1"], p["ffn_w2"], p["ffn_b2"])
    return x2d.reshape(B, T, D)


# ------------------------------------------------------------------ pure-JAX reference

def encoder_layer_ref(x, mask_add2d, p, num_heads):
    B, T, D = x.shape
    dk = D // num_heads

    def ln(v, g, b):
        m = jnp.mean(v, -1, keepdims=True)
        var = jnp.mean((v - m) ** 2, -1, keepdims=True)
        return (v - m) * lax.rsqrt(var + _LN_EPS) * g.reshape(-1) + b.reshape(-1)

    xn = ln(x, p["ln1_g"], p["ln1_b"])
    q = xn @ p["wq"].astype(jnp.float32) + p["bq"]
    kv = xn @ p["wkv"].astype(jnp.float32) + p["bkv"]
    k, v = kv[..., :D], kv[..., D:]
    q = q.reshape(B, T, num_heads, dk).transpose(0, 2, 1, 3)
    k = k.reshape(B, T, num_heads, dk).transpose(0, 2, 1, 3)
    v = v.reshape(B, T, num_heads, dk).transpose(0, 2, 1, 3)
    s = jnp.einsum("bhqd,bhkd->bhqk", q, k) / math.sqrt(dk) + mask_add2d
    pr = jax.nn.softmax(s, axis=-1)
    o = jnp.einsum("bhqk,bhkd->bhqd", pr, v).transpose(0, 2, 1, 3).reshape(B, T, D)
    x = x + o @ p["wo"].astype(jnp.float32) + p["bo"]
    xn2 = ln(x, p["ln2_g"], p["ln2_b"])
    h = jnp.maximum(xn2 @ p["ffn_w1"].astype(jnp.float32) + p["ffn_b1"], 0.0)
    return x + h @ p["ffn_w2"].astype(jnp.float32) + p["ffn_b2"]


# ------------------------------------------------------------------ params

def init_params(key, d_model, d_ff):
    def dense(k, fan_in, fan_out):
        # matmul weights stored in bf16 (MXU operands); f32 accumulation in-kernel
        return (jax.random.normal(k, (fan_in, fan_out), jnp.float32) * 0.02
                ).astype(jnp.bfloat16)

    ks = jax.random.split(key, 5)
    return {
        # sublayer 1: self-attention
        "ln1_g": jnp.ones((1, d_model), jnp.float32),
        "ln1_b": jnp.zeros((1, d_model), jnp.float32),
        "wq": dense(ks[0], d_model, d_model),
        "bq": jnp.zeros((1, d_model), jnp.float32),
        "wkv": dense(ks[1], d_model, 2 * d_model),
        "bkv": jnp.zeros((1, 2 * d_model), jnp.float32),
        "wo": dense(ks[2], d_model, d_model),
        "bo": jnp.zeros((1, d_model), jnp.float32),
        # sublayer 2: position-wise feed-forward
        "ln2_g": jnp.ones((1, d_model), jnp.float32),
        "ln2_b": jnp.zeros((1, d_model), jnp.float32),
        "ffn_w1": dense(ks[3], d_model, d_ff),
        "ffn_b1": jnp.zeros((1, d_ff), jnp.float32),
        "ffn_w2": dense(ks[4], d_ff, d_model),
        "ffn_b2": jnp.zeros((1, d_model), jnp.float32),
    }


# ------------------------------------------------------------------ main

if __name__ == "__main__":
    B, T = 2, 8
    D_MODEL, N_HEADS, D_FF = 32, 4, 64

    key = jax.random.PRNGKey(0)
    kx, kp = jax.random.split(key)

    x = jax.random.normal(kx, (B, T, D_MODEL), jnp.float32)
    params = init_params(kp, D_MODEL, D_FF)

    # mask=None in the reference forward -> no masking; additive mask of zeros
    # (masked_fill(mask==0, -1e9) semantics: 0 = attend, -1e9 = blocked).
    mask_add = jnp.zeros((T, T), jnp.float32)

    fwd = jax.jit(functools.partial(encoder_layer_fwd, num_heads=N_HEADS))
    out = jax.block_until_ready(fwd(x, mask_add, params))

    assert out.shape == (B, T, D_MODEL)
    assert bool(jnp.all(jnp.isfinite(out)))

    # tolerance-asserted pure-JAX reference (bf16 activations / approx reciprocal
    # mean it will not bit-match, but it should be well within 5e-2)
    ref = encoder_layer_ref(x, mask_add, params, N_HEADS)
    assert bool(jnp.allclose(out, ref, atol=5e-2, rtol=5e-2))

    print("KERNEL_OK")
</pallas_src>

<mosaic_0001>
module attributes {stable_mosaic.version = 11 : i64} {
  func.func @_ln_qkv_kernel(%arg0: i32, %arg1: memref<16x32xf32, #tpu.memory_space<vmem>>, %arg2: memref<1x32xf32, #tpu.memory_space<vmem>>, %arg3: memref<1x32xf32, #tpu.memory_space<vmem>>, %arg4: memref<32x32xbf16, #tpu.memory_space<vmem>>, %arg5: memref<1x32xf32, #tpu.memory_space<vmem>>, %arg6: memref<32x64xbf16, #tpu.memory_space<vmem>>, %arg7: memref<1x64xf32, #tpu.memory_space<vmem>>, %arg8: memref<16x32xbf16, #tpu.memory_space<vmem>>, %arg9: memref<16x64xbf16, #tpu.memory_space<vmem>>) attributes {dimension_semantics = [#tpu.dimension_semantics<parallel>], iteration_bounds = array<i64: 1>, scalar_prefetch = 0 : i64, scratch_operands = 0 : i64, tpu.core_type = #tpu.core_type<tc>, window_params = [{transform_indices = @transform_0, window_bounds = array<i64: 16, 32>}, {pipeline_mode = #tpu.pipeline_mode<synchronous>, transform_indices = @transform_1, window_bounds = array<i64: 1, 32>}, {pipeline_mode = #tpu.pipeline_mode<synchronous>, transform_indices = @transform_2, window_bounds = array<i64: 1, 32>}, {pipeline_mode = #tpu.pipeline_mode<synchronous>, transform_indices = @transform_3, window_bounds = array<i64: 32, 32>}, {pipeline_mode = #tpu.pipeline_mode<synchronous>, transform_indices = @transform_4, window_bounds = array<i64: 1, 32>}, {pipeline_mode = #tpu.pipeline_mode<synchronous>, transform_indices = @transform_5, window_bounds = array<i64: 32, 64>}, {pipeline_mode = #tpu.pipeline_mode<synchronous>, transform_indices = @transform_6, window_bounds = array<i64: 1, 64>}, {transform_indices = @transform_7, window_bounds = array<i64: 16, 32>}, {transform_indices = @transform_8, window_bounds = array<i64: 16, 64>}]} {
    %c0 = arith.constant 0 : index
    %c0_0 = arith.constant 0 : index
    %0 = vector.load %arg1[%c0, %c0_0] : memref<16x32xf32, #tpu.memory_space<vmem>>, vector<16x32xf32>
    %c0_1 = arith.constant 0 : index
    %c0_2 = arith.constant 0 : index
    %1 = vector.load %arg2[%c0_1, %c0_2] : memref<1x32xf32, #tpu.memory_space<vmem>>, vector<1x32xf32>
    %c0_3 = arith.constant 0 : index
    %c0_4 = arith.constant 0 : index
    %2 = vector.load %arg3[%c0_3, %c0_4] : memref<1x32xf32, #tpu.memory_space<vmem>>, vector<1x32xf32>
    %cst = arith.constant dense<0.000000e+00> : vector<16xf32>
    %3 = vector.multi_reduction <add>, %0, %cst [1] : vector<16x32xf32> to vector<16xf32>
    %4 = vector.shape_cast %3 : vector<16xf32> to vector<16x1xf32>
    %cst_5 = arith.constant 3.200000e+01 : f32
    %5 = vector.broadcast %cst_5 : f32 to vector<16x1xf32>
    %6 = arith.divf %4, %5 : vector<16x1xf32>
    %7 = vector.broadcast %6 : vector<16x1xf32> to vector<16x32xf32>
    %8 = arith.subf %0, %7 : vector<16x32xf32>
    %9 = arith.mulf %8, %8 : vector<16x32xf32>
    %cst_6 = arith.constant dense<0.000000e+00> : vector<16xf32>
    %10 = vector.multi_reduction <add>, %9, %cst_6 [1] : vector<16x32xf32> to vector<16xf32>
    %11 = vector.shape_cast %10 : vector<16xf32> to vector<16x1xf32>
    %cst_7 = arith.constant 3.200000e+01 : f32
    %12 = vector.broadcast %cst_7 : f32 to vector<16x1xf32>
    %13 = arith.divf %11, %12 : vector<16x1xf32>
    %14 = vector.broadcast %6 : vector<16x1xf32> to vector<16x32xf32>
    %15 = arith.subf %0, %14 : vector<16x32xf32>
    %cst_8 = arith.constant 9.99999974E-6 : f32
    %16 = vector.broadcast %cst_8 : f32 to vector<16x1xf32>
    %17 = arith.addf %13, %16 : vector<16x1xf32>
    %18 = math.rsqrt %17 : vector<16x1xf32>
    %19 = vector.broadcast %18 : vector<16x1xf32> to vector<16x32xf32>
    %20 = arith.mulf %15, %19 : vector<16x32xf32>
    %21 = vector.broadcast %1 : vector<1x32xf32> to vector<16x32xf32>
    %22 = arith.mulf %20, %21 : vector<16x32xf32>
    %23 = vector.broadcast %2 : vector<1x32xf32> to vector<16x32xf32>
    %24 = arith.addf %22, %23 : vector<16x32xf32>
    %25 = arith.truncf %24 : vector<16x32xf32> to vector<16x32xbf16>
    %c0_9 = arith.constant 0 : index
    %c0_10 = arith.constant 0 : index
    %26 = vector.load %arg4[%c0_9, %c0_10] : memref<32x32xbf16, #tpu.memory_space<vmem>>, vector<32x32xbf16>
    %cst_11 = arith.constant dense<0.000000e+00> : vector<16x32xf32>
    %27 = tpu.matmul %25, %26, %cst_11 {dimension_numbers = #tpu.dot_dimension_numbers<[1], [0], [0], [1], [0, 0, 1, 1], [], []>} : vector<16x32xbf16>, vector<32x32xbf16>, vector<16x32xf32> -> vector<16x32xf32>
    %c0_12 = arith.constant 0 : index
    %c0_13 = arith.constant 0 : index
    %28 = vector.load %arg5[%c0_12, %c0_13] : memref<1x32xf32, #tpu.memory_space<vmem>>, vector<1x32xf32>
    %29 = vector.broadcast %28 : vector<1x32xf32> to vector<16x32xf32>
    %30 = arith.addf %27, %29 : vector<16x32xf32>
    %31 = arith.truncf %30 : vector<16x32xf32> to vector<16x32xbf16>
    %c0_14 = arith.constant 0 : index
    %c0_15 = arith.constant 0 : index
    %32 = vector.load %arg8[%c0_14, %c0_15] : memref<16x32xbf16, #tpu.memory_space<vmem>>, vector<16x32xbf16>
    tpu.vector_store %arg8[%c0_14, %c0_15], %31 {strides = array<i32>} : memref<16x32xbf16, #tpu.memory_space<vmem>>, vector<16x32xbf16>,
    %c0_16 = arith.constant 0 : index
    %c0_17 = arith.constant 0 : index
    %33 = vector.load %arg6[%c0_16, %c0_17] : memref<32x64xbf16, #tpu.memory_space<vmem>>, vector<32x64xbf16>
    %cst_18 = arith.constant dense<0.000000e+00> : vector<16x64xf32>
    %34 = tpu.matmul %25, %33, %cst_18 {dimension_numbers = #tpu.dot_dimension_numbers<[1], [0], [0], [1], [0, 0, 1, 1], [], []>} : vector<16x32xbf16>, vector<32x64xbf16>, vector<16x64xf32> -> vector<16x64xf32>
    %c0_19 = arith.constant 0 : index
    %c0_20 = arith.constant 0 : index
    %35 = vector.load %arg7[%c0_19, %c0_20] : memref<1x64xf32, #tpu.memory_space<vmem>>, vector<1x64xf32>
    %36 = vector.broadcast %35 : vector<1x64xf32> to vector<16x64xf32>
    %37 = arith.addf %34, %36 : vector<16x64xf32>
    %38 = arith.truncf %37 : vector<16x64xf32> to vector<16x64xbf16>
    %c0_21 = arith.constant 0 : index
    %c0_22 = arith.constant 0 : index
    %39 = vector.load %arg9[%c0_21, %c0_22] : memref<16x64xbf16, #tpu.memory_space<vmem>>, vector<16x64xbf16>
    tpu.vector_store %arg9[%c0_21, %c0_22], %38 {strides = array<i32>} : memref<16x64xbf16, #tpu.memory_space<vmem>>, vector<16x64xbf16>,
    return
  }
  func.func @transform_0(%arg0: i32) -> (i32, i32) {
    %c0_i32 = arith.constant 0 : i32
    %c0_i32_0 = arith.constant 0 : i32
    return %arg0, %c0_i32 : i32, i32
  }
  func.func @transform_1(%arg0: i32) -> (i32, i32) {
    %c0_i32 = arith.constant 0 : i32
    %c0_i32_0 = arith.constant 0 : i32
    %c0_i32_1 = arith.constant 0 : i32
    return %c0_i32, %c0_i32_0 : i32, i32
  }
  func.func @transform_2(%arg0: i32) -> (i32, i32) {
    %c0_i32 = arith.constant 0 : i32
    %c0_i32_0 = arith.constant 0 : i32
    %c0_i32_1 = arith.constant 0 : i32
    return %c0_i32, %c0_i32_0 : i32, i32
  }
  func.func @transform_3(%arg0: i32) -> (i32, i32) {
    %c0_i32 = arith.constant 0 : i32
    %c0_i32_0 = arith.constant 0 : i32
    %c0_i32_1 = arith.constant 0 : i32
    return %c0_i32, %c0_i32_0 : i32, i32
  }
  func.func @transform_4(%arg0: i32) -> (i32, i32) {
    %c0_i32 = arith.constant 0 : i32
    %c0_i32_0 = arith.constant 0 : i32
    %c0_i32_1 = arith.constant 0 : i32
    return %c0_i32, %c0_i32_0 : i32, i32
  }
  func.func @transform_5(%arg0: i32) -> (i32, i32) {
    %c0_i32 = arith.constant 0 : i32
    %c0_i32_0 = arith.constant 0 : i32
    %c0_i32_1 = arith.constant 0 : i32
    return %c0_i32, %c0_i32_0 : i32, i32
  }
  func.func @transform_6(%arg0: i32) -> (i32, i32) {
    %c0_i32 = arith.constant 0 : i32
    %c0_i32_0 = arith.constant 0 : i32
    %c0_i32_1 = arith.constant 0 : i32
    return %c0_i32, %c0_i32_0 : i32, i32
  }
  func.func @transform_7(%arg0: i32) -> (i32, i32) {
    %c0_i32 = arith.constant 0 : i32
    %c0_i32_0 = arith.constant 0 : i32
    return %arg0, %c0_i32 : i32, i32
  }
  func.func @transform_8(%arg0: i32) -> (i32, i32) {
    %c0_i32 = arith.constant 0 : i32
    %c0_i32_0 = arith.constant 0 : i32
    return %arg0, %c0_i32 : i32, i32
  }
}

module attributes {stable_mosaic.version = 11 : i64} {
  func.func @_attn_kernel(%arg0: i32, %arg1: i32, %arg2: memref<8x32xbf16, #tpu.memory_space<vmem>>, %arg3: memref<8x64xbf16, #tpu.memory_space<vmem>>, %arg4: memref<8x8xf32, #tpu.memory_space<vmem>>, %arg5: memref<8x32xf32, #tpu.memory_space<vmem>>, %arg6: memref<32x32xbf16, #tpu.memory_space<vmem>>, %arg7: memref<1x32xf32, #tpu.memory_space<vmem>>, %arg8: memref<8x32xbf16, #tpu.memory_space<vmem>>) attributes {dimension_semantics = [#tpu.dimension_semantics<parallel>, #tpu.dimension_semantics<parallel>], iteration_bounds = array<i64: 2, 1>, scalar_prefetch = 0 : i64, scratch_operands = 0 : i64, tpu.core_type = #tpu.core_type<tc>, window_params = [{transform_indices = @transform_0, window_bounds = array<i64: 8, 32>}, {transform_indices = @transform_1, window_bounds = array<i64: 8, 64>}, {transform_indices = @transform_2, window_bounds = array<i64: 8, 8>}, {transform_indices = @transform_3, window_bounds = array<i64: 8, 32>}, {pipeline_mode = #tpu.pipeline_mode<synchronous>, transform_indices = @transform_4, window_bounds = array<i64: 32, 32>}, {pipeline_mode = #tpu.pipeline_mode<synchronous>, transform_indices = @transform_5, window_bounds = array<i64: 1, 32>}, {transform_indices = @transform_6, window_bounds = array<i64: 8, 32>}]} {
    %c0 = arith.constant 0 : index
    %c0_0 = arith.constant 0 : index
    %0 = vector.load %arg2[%c0, %c0_0] : memref<8x32xbf16, #tpu.memory_space<vmem>>, vector<8x32xbf16>
    %c0_1 = arith.constant 0 : index
    %c0_2 = arith.constant 0 : index
    %1 = vector.load %arg3[%c0_1, %c0_2] : memref<8x64xbf16, #tpu.memory_space<vmem>>, vector<8x64xbf16>
    %c0_3 = arith.constant 0 : index
    %c0_4 = arith.constant 0 : index
    %2 = vector.load %arg4[%c0_3, %c0_4] : memref<8x8xf32, #tpu.memory_space<vmem>>, vector<8x8xf32>
    %c0_5 = arith.constant 0 : index
    %c0_6 = arith.constant 0 : index
    %3 = vector.load %arg6[%c0_5, %c0_6] : memref<32x32xbf16, #tpu.memory_space<vmem>>, vector<32x32xbf16>
    %cst = arith.constant 0.000000e+00 : f32
    %4 = vector.broadcast %cst : f32 to vector<8x32xf32>
    %5 = vector.extract_strided_slice %0 {offsets = [0, 0], sizes = [8, 8], strides = [1, 1]} : vector<8x32xbf16> to vector<8x8xbf16>
    %6 = vector.extract_strided_slice %1 {offsets = [0, 0], sizes = [8, 8], strides = [1, 1]} : vector<8x64xbf16> to vector<8x8xbf16>
    %7 = vector.extract_strided_slice %1 {offsets = [0, 32], sizes = [8, 8], strides = [1, 1]} : vector<8x64xbf16> to vector<8x8xbf16>
    %cst_7 = arith.constant dense<0.000000e+00> : vector<8x8xf32>
    %8 = tpu.matmul %5, %6, %cst_7 {dimension_numbers = #tpu.dot_dimension_numbers<[1], [1], [0], [0], [0, 0, 1, 0], [], []>} : vector<8x8xbf16>, vector<8x8xbf16>, vector<8x8xf32> -> vector<8x8xf32>
    %cst_8 = arith.constant 0.353553385 : f32
    %9 = vector.broadcast %cst_8 : f32 to vector<8x8xf32>
    %10 = arith.mulf %8, %9 : vector<8x8xf32>
    %11 = arith.addf %10, %2 : vector<8x8xf32>
    %cst_9 = arith.constant dense<0xFF800000> : vector<8xf32>
    %12 = vector.multi_reduction <maximumf>, %11, %cst_9 [1] : vector<8x8xf32> to vector<8xf32>
    %13 = vector.shape_cast %12 : vector<8xf32> to vector<8x1xf32>
    %14 = vector.broadcast %13 : vector<8x1xf32> to vector<8x8xf32>
    %15 = arith.subf %11, %14 : vector<8x8xf32>
    %16 = math.exp %15 : vector<8x8xf32>
    %cst_10 = arith.constant dense<0.000000e+00> : vector<8xf32>
    %17 = vector.multi_reduction <add>, %16, %cst_10 [1] : vector<8x8xf32> to vector<8xf32>
    %18 = vector.shape_cast %17 : vector<8xf32> to vector<8x1xf32>
    %19 = tpu.reciprocal %18 {approx = true} : vector<8x1xf32> -> vector<8x1xf32>
    %20 = vector.broadcast %19 : vector<8x1xf32> to vector<8x8xf32>
    %21 = arith.mulf %16, %20 : vector<8x8xf32>
    %22 = arith.truncf %21 : vector<8x8xf32> to vector<8x8xbf16>
    %cst_11 = arith.constant dense<0.000000e+00> : vector<8x8xf32>
    %23 = tpu.matmul %22, %7, %cst_11 {dimension_numbers = #tpu.dot_dimension_numbers<[1], [0], [0], [1], [0, 0, 1, 1], [], []>} : vector<8x8xbf16>, vector<8x8xbf16>, vector<8x8xf32> -> vector<8x8xf32>
    %24 = arith.truncf %23 : vector<8x8xf32> to vector<8x8xbf16>
    %25 = vector.extract_strided_slice %3 {offsets = [0, 0], sizes = [8, 32], strides = [1, 1]} : vector<32x32xbf16> to vector<8x32xbf16>
    %cst_12 = arith.constant dense<0.000000e+00> : vector<8x32xf32>
    %26 = tpu.matmul %24, %25, %cst_12 {dimension_numbers = #tpu.dot_dimension_numbers<[1], [0], [0], [1], [0, 0, 1, 1], [], []>} : vector<8x8xbf16>, vector<8x32xbf16>, vector<8x32xf32> -> vector<8x32xf32>
    %27 = arith.addf %4, %26 : vector<8x32xf32>
    %28 = vector.extract_strided_slice %0 {offsets = [0, 8], sizes = [8, 8], strides = [1, 1]} : vector<8x32xbf16> to vector<8x8xbf16>
    %29 = vector.extract_strided_slice %1 {offsets = [0, 8], sizes = [8, 8], strides = [1, 1]} : vector<8x64xbf16> to vector<8x8xbf16>
    %30 = vector.extract_strided_slice %1 {offsets = [0, 40], sizes = [8, 8], strides = [1, 1]} : vector<8x64xbf16> to vector<8x8xbf16>
    %cst_13 = arith.constant dense<0.000000e+00> : vector<8x8xf32>
    %31 = tpu.matmul %28, %29, %cst_13 {dimension_numbers = #tpu.dot_dimension_numbers<[1], [1], [0], [0], [0, 0, 1, 0], [], []>} : vector<8x8xbf16>, vector<8x8xbf16>, vector<8x8xf32> -> vector<8x8xf32>
    %cst_14 = arith.constant 0.353553385 : f32
    %32 = vector.broadcast %cst_14 : f32 to vector<8x8xf32>
    %33 = arith.mulf %31, %32 : vector<8x8xf32>
    %34 = arith.addf %33, %2 : vector<8x8xf32>
    %cst_15 = arith.constant dense<0xFF800000> : vector<8xf32>
    %35 = vector.multi_reduction <maximumf>, %34, %cst_15 [1] : vector<8x8xf32> to vector<8xf32>
    %36 = vector.shape_cast %35 : vector<8xf32> to vector<8x1xf32>
    %37 = vector.broadcast %36 : vector<8x1xf32> to vector<8x8xf32>
    %38 = arith.subf %34, %37 : vector<8x8xf32>
    %39 = math.exp %38 : vector<8x8xf32>
    %cst_16 = arith.constant dense<0.000000e+00> : vector<8xf32>
    %40 = vector.multi_reduction <add>, %39, %cst_16 [1] : vector<8x8xf32> to vector<8xf32>
    %41 = vector.shape_cast %40 : vector<8xf32> to vector<8x1xf32>
    %42 = tpu.reciprocal %41 {approx = true} : vector<8x1xf32> -> vector<8x1xf32>
    %43 = vector.broadcast %42 : vector<8x1xf32> to vector<8x8xf32>
    %44 = arith.mulf %39, %43 : vector<8x8xf32>
    %45 = arith.truncf %44 : vector<8x8xf32> to vector<8x8xbf16>
    %cst_17 = arith.constant dense<0.000000e+00> : vector<8x8xf32>
    %46 = tpu.matmul %45, %30, %cst_17 {dimension_numbers = #tpu.dot_dimension_numbers<[1], [0], [0], [1], [0, 0, 1, 1], [], []>} : vector<8x8xbf16>, vector<8x8xbf16>, vector<8x8xf32> -> vector<8x8xf32>
    %47 = arith.truncf %46 : vector<8x8xf32> to vector<8x8xbf16>
    %48 = vector.extract_strided_slice %3 {offsets = [8, 0], sizes = [8, 32], strides = [1, 1]} : vector<32x32xbf16> to vector<8x32xbf16>
    %cst_18 = arith.constant dense<0.000000e+00> : vector<8x32xf32>
    %49 = tpu.matmul %47, %48, %cst_18 {dimension_numbers = #tpu.dot_dimension_numbers<[1], [0], [0], [1], [0, 0, 1, 1], [], []>} : vector<8x8xbf16>, vector<8x32xbf16>, vector<8x32xf32> -> vector<8x32xf32>
    %50 = arith.addf %27, %49 : vector<8x32xf32>
    %51 = vector.extract_strided_slice %0 {offsets = [0, 16], sizes = [8, 8], strides = [1, 1]} : vector<8x32xbf16> to vector<8x8xbf16>
    %52 = vector.extract_strided_slice %1 {offsets = [0, 16], sizes = [8, 8], strides = [1, 1]} : vector<8x64xbf16> to vector<8x8xbf16>
    %53 = vector.extract_strided_slice %1 {offsets = [0, 48], sizes = [8, 8], strides = [1, 1]} : vector<8x64xbf16> to vector<8x8xbf16>
    %cst_19 = arith.constant dense<0.000000e+00> : vector<8x8xf32>
    %54 = tpu.matmul %51, %52, %cst_19 {dimension_numbers = #tpu.dot_dimension_numbers<[1], [1], [0], [0], [0, 0, 1, 0], [], []>} : vector<8x8xbf16>, vector<8x8xbf16>, vector<8x8xf32> -> vector<8x8xf32>
    %cst_20 = arith.constant 0.353553385 : f32
    %55 = vector.broadcast %cst_20 : f32 to vector<8x8xf32>
    %56 = arith.mulf %54, %55 : vector<8x8xf32>
    %57 = arith.addf %56, %2 : vector<8x8xf32>
    %cst_21 = arith.constant dense<0xFF800000> : vector<8xf32>
    %58 = vector.multi_reduction <maximumf>, %57, %cst_21 [1] : vector<8x8xf32> to vector<8xf32>
    %59 = vector.shape_cast %58 : vector<8xf32> to vector<8x1xf32>
    %60 = vector.broadcast %59 : vector<8x1xf32> to vector<8x8xf32>
    %61 = arith.subf %57, %60 : vector<8x8xf32>
    %62 = math.exp %61 : vector<8x8xf32>
    %cst_22 = arith.constant dense<0.000000e+00> : vector<8xf32>
    %63 = vector.multi_reduction <add>, %62, %cst_22 [1] : vector<8x8xf32> to vector<8xf32>
    %64 = vector.shape_cast %63 : vector<8xf32> to vector<8x1xf32>
    %65 = tpu.reciprocal %64 {approx = true} : vector<8x1xf32> -> vector<8x1xf32>
    %66 = vector.broadcast %65 : vector<8x1xf32> to vector<8x8xf32>
    %67 = arith.mulf %62, %66 : vector<8x8xf32>
    %68 = arith.truncf %67 : vector<8x8xf32> to vector<8x8xbf16>
    %cst_23 = arith.constant dense<0.000000e+00> : vector<8x8xf32>
    %69 = tpu.matmul %68, %53, %cst_23 {dimension_numbers = #tpu.dot_dimension_numbers<[1], [0], [0], [1], [0, 0, 1, 1], [], []>} : vector<8x8xbf16>, vector<8x8xbf16>, vector<8x8xf32> -> vector<8x8xf32>
    %70 = arith.truncf %69 : vector<8x8xf32> to vector<8x8xbf16>
    %71 = vector.extract_strided_slice %3 {offsets = [16, 0], sizes = [8, 32], strides = [1, 1]} : vector<32x32xbf16> to vector<8x32xbf16>
    %cst_24 = arith.constant dense<0.000000e+00> : vector<8x32xf32>
    %72 = tpu.matmul %70, %71, %cst_24 {dimension_numbers = #tpu.dot_dimension_numbers<[1], [0], [0], [1], [0, 0, 1, 1], [], []>} : vector<8x8xbf16>, vector<8x32xbf16>, vector<8x32xf32> -> vector<8x32xf32>
    %73 = arith.addf %50, %72 : vector<8x32xf32>
    %74 = vector.extract_strided_slice %0 {offsets = [0, 24], sizes = [8, 8], strides = [1, 1]} : vector<8x32xbf16> to vector<8x8xbf16>
    %75 = vector.extract_strided_slice %1 {offsets = [0, 24], sizes = [8, 8], strides = [1, 1]} : vector<8x64xbf16> to vector<8x8xbf16>
    %76 = vector.extract_strided_slice %1 {offsets = [0, 56], sizes = [8, 8], strides = [1, 1]} : vector<8x64xbf16> to vector<8x8xbf16>
    %cst_25 = arith.constant dense<0.000000e+00> : vector<8x8xf32>
    %77 = tpu.matmul %74, %75, %cst_25 {dimension_numbers = #tpu.dot_dimension_numbers<[1], [1], [0], [0], [0, 0, 1, 0], [], []>} : vector<8x8xbf16>, vector<8x8xbf16>, vector<8x8xf32> -> vector<8x8xf32>
    %cst_26 = arith.constant 0.353553385 : f32
    %78 = vector.broadcast %cst_26 : f32 to vector<8x8xf32>
    %79 = arith.mulf %77, %78 : vector<8x8xf32>
    %80 = arith.addf %79, %2 : vector<8x8xf32>
    %cst_27 = arith.constant dense<0xFF800000> : vector<8xf32>
    %81 = vector.multi_reduction <maximumf>, %80, %cst_27 [1] : vector<8x8xf32> to vector<8xf32>
    %82 = vector.shape_cast %81 : vector<8xf32> to vector<8x1xf32>
    %83 = vector.broadcast %82 : vector<8x1xf32> to vector<8x8xf32>
    %84 = arith.subf %80, %83 : vector<8x8xf32>
    %85 = math.exp %84 : vector<8x8xf32>
    %cst_28 = arith.constant dense<0.000000e+00> : vector<8xf32>
    %86 = vector.multi_reduction <add>, %85, %cst_28 [1] : vector<8x8xf32> to vector<8xf32>
    %87 = vector.shape_cast %86 : vector<8xf32> to vector<8x1xf32>
    %88 = tpu.reciprocal %87 {approx = true} : vector<8x1xf32> -> vector<8x1xf32>
    %89 = vector.broadcast %88 : vector<8x1xf32> to vector<8x8xf32>
    %90 = arith.mulf %85, %89 : vector<8x8xf32>
    %91 = arith.truncf %90 : vector<8x8xf32> to vector<8x8xbf16>
    %cst_29 = arith.constant dense<0.000000e+00> : vector<8x8xf32>
    %92 = tpu.matmul %91, %76, %cst_29 {dimension_numbers = #tpu.dot_dimension_numbers<[1], [0], [0], [1], [0, 0, 1, 1], [], []>} : vector<8x8xbf16>, vector<8x8xbf16>, vector<8x8xf32> -> vector<8x8xf32>
    %93 = arith.truncf %92 : vector<8x8xf32> to vector<8x8xbf16>
    %94 = vector.extract_strided_slice %3 {offsets = [24, 0], sizes = [8, 32], strides = [1, 1]} : vector<32x32xbf16> to vector<8x32xbf16>
    %cst_30 = arith.constant dense<0.000000e+00> : vector<8x32xf32>
    %95 = tpu.matmul %93, %94, %cst_30 {dimension_numbers = #tpu.dot_dimension_numbers<[1], [0], [0], [1], [0, 0, 1, 1], [], []>} : vector<8x8xbf16>, vector<8x32xbf16>, vector<8x32xf32> -> vector<8x32xf32>
    %96 = arith.addf %73, %95 : vector<8x32xf32>
    %c0_31 = arith.constant 0 : index
    %c0_32 = arith.constant 0 : index
    %97 = vector.load %arg7[%c0_31, %c0_32] : memref<1x32xf32, #tpu.memory_space<vmem>>, vector<1x32xf32>
    %98 = vector.broadcast %97 : vector<1x32xf32> to vector<8x32xf32>
    %99 = arith.addf %96, %98 : vector<8x32xf32>
    %c0_33 = arith.constant 0 : index
    %c0_34 = arith.constant 0 : index
    %100 = vector.load %arg5[%c0_33, %c0_34] : memref<8x32xf32, #tpu.memory_space<vmem>>, vector<8x32xf32>
    %101 = arith.addf %99, %100 : vector<8x32xf32>
    %102 = arith.truncf %101 : vector<8x32xf32> to vector<8x32xbf16>
    %c0_35 = arith.constant 0 : index
    %c0_36 = arith.constant 0 : index
    %103 = vector.load %arg8[%c0_35, %c0_36] : memref<8x32xbf16, #tpu.memory_space<vmem>>, vector<8x32xbf16>
    tpu.vector_store %arg8[%c0_35, %c0_36], %102 {strides = array<i32>} : memref<8x32xbf16, #tpu.memory_space<vmem>>, vector<8x32xbf16>,
    return
  }
  func.func @transform_0(%arg0: i32, %arg1: i32) -> (i32, i32) {
    %c1_i32 = arith.constant 1 : i32
    %0 = arith.muli %arg0, %c1_i32 : i32
    %1 = arith.addi %0, %arg1 : i32
    %c0_i32 = arith.constant 0 : i32
    %c0_i32_0 = arith.constant 0 : i32
    return %1, %c0_i32 : i32, i32
  }
  func.func @transform_1(%arg0: i32, %arg1: i32) -> (i32, i32) {
    %c0_i32 = arith.constant 0 : i32
    %c0_i32_0 = arith.constant 0 : i32
    return %arg0, %c0_i32 : i32, i32
  }
  func.func @transform_2(%arg0: i32, %arg1: i32) -> (i32, i32) {
    %c0_i32 = arith.constant 0 : i32
    %c0_i32_0 = arith.constant 0 : i32
    return %arg1, %c0_i32 : i32, i32
  }
  func.func @transform_3(%arg0: i32, %arg1: i32) -> (i32, i32) {
    %c1_i32 = arith.constant 1 : i32
    %0 = arith.muli %arg0, %c1_i32 : i32
    %1 = arith.addi %0, %arg1 : i32
    %c0_i32 = arith.constant 0 : i32
    %c0_i32_0 = arith.constant 0 : i32
    return %1, %c0_i32 : i32, i32
  }
  func.func @transform_4(%arg0: i32, %arg1: i32) -> (i32, i32) {
    %c0_i32 = arith.constant 0 : i32
    %c0_i32_0 = arith.constant 0 : i32
    %c0_i32_1 = arith.constant 0 : i32
    return %c0_i32, %c0_i32_0 : i32, i32
  }
  func.func @transform_5(%arg0: i32, %arg1: i32) -> (i32, i32) {
    %c0_i32 = arith.constant 0 : i32
    %c0_i32_0 = arith.constant 0 : i32
    %c0_i32_1 = arith.constant 0 : i32
    return %c0_i32, %c0_i32_0 : i32, i32
  }
  func.func @transform_6(%arg0: i32, %arg1: i32) -> (i32, i32) {
    %c1_i32 = arith.constant 1 : i32
    %0 = arith.muli %arg0, %c1_i32 : i32
    %1 = arith.addi %0, %arg1 : i32
    %c0_i32 = arith.constant 0 : i32
    %c0_i32_0 = arith.constant 0 : i32
    return %1, %c0_i32 : i32, i32
  }
}

module attributes {stable_mosaic.version = 11 : i64} {
  func.func @_ln_ffn_kernel(%arg0: i32, %arg1: i32, %arg2: memref<16x32xbf16, #tpu.memory_space<vmem>>, %arg3: memref<1x32xf32, #tpu.memory_space<vmem>>, %arg4: memref<1x32xf32, #tpu.memory_space<vmem>>, %arg5: memref<32x64xbf16, #tpu.memory_space<vmem>>, %arg6: memref<1x64xf32, #tpu.memory_space<vmem>>, %arg7: memref<64x32xbf16, #tpu.memory_space<vmem>>, %arg8: memref<1x32xf32, #tpu.memory_space<vmem>>, %arg9: memref<16x32xf32, #tpu.memory_space<vmem>>, %arg10: memref<16x32xbf16, #tpu.memory_space<vmem>>, %arg11: memref<16x32xf32, #tpu.memory_space<vmem>>) attributes {dimension_semantics = [#tpu.dimension_semantics<parallel>, #tpu.dimension_semantics<arbitrary>], iteration_bounds = array<i64: 1, 1>, scalar_prefetch = 0 : i64, scratch_operands = 2 : i64, tpu.core_type = #tpu.core_type<tc>, window_params = [{transform_indices = @transform_0, window_bounds = array<i64: 16, 32>}, {pipeline_mode = #tpu.pipeline_mode<synchronous>, transform_indices = @transform_1, window_bounds = array<i64: 1, 32>}, {pipeline_mode = #tpu.pipeline_mode<synchronous>, transform_indices = @transform_2, window_bounds = array<i64: 1, 32>}, {transform_indices = @transform_3, window_bounds = array<i64: 32, 64>}, {transform_indices = @transform_4, window_bounds = array<i64: 1, 64>}, {transform_indices = @transform_5, window_bounds = array<i64: 64, 32>}, {pipeline_mode = #tpu.pipeline_mode<synchronous>, transform_indices = @transform_6, window_bounds = array<i64: 1, 32>}, {transform_indices = @transform_7, window_bounds = array<i64: 16, 32>}]} {
    %c0_i32 = arith.constant 0 : i32
    %0 = arith.cmpi eq, %arg1, %c0_i32 : i32
    %1 = arith.extui %0 : i1 to i32
    %c0_i32_0 = arith.constant 0 : i32
    %2 = arith.cmpi ne, %1, %c0_i32_0 : i32
    scf.if %2 {
      %c0_16 = arith.constant 0 : index
      %c0_17 = arith.constant 0 : index
      %20 = vector.load %arg2[%c0_16, %c0_17] : memref<16x32xbf16, #tpu.memory_space<vmem>>, vector<16x32xbf16>
      %21 = arith.extf %20 : vector<16x32xbf16> to vector<16x32xf32>
      %c0_18 = arith.constant 0 : index
      %c0_19 = arith.constant 0 : index
      %22 = vector.load %arg3[%c0_18, %c0_19] : memref<1x32xf32, #tpu.memory_space<vmem>>, vector<1x32xf32>
      %c0_20 = arith.constant 0 : index
      %c0_21 = arith.constant 0 : index
      %23 = vector.load %arg4[%c0_20, %c0_21] : memref<1x32xf32, #tpu.memory_space<vmem>>, vector<1x32xf32>
      %cst_22 = arith.constant dense<0.000000e+00> : vector<16xf32>
      %24 = vector.multi_reduction <add>, %21, %cst_22 [1] : vector<16x32xf32> to vector<16xf32>
      %25 = vector.shape_cast %24 : vector<16xf32> to vector<16x1xf32>
      %cst_23 = arith.constant 3.200000e+01 : f32
      %26 = vector.broadcast %cst_23 : f32 to vector<16x1xf32>
      %27 = arith.divf %25, %26 : vector<16x1xf32>
      %28 = vector.broadcast %27 : vector<16x1xf32> to vector<16x32xf32>
      %29 = arith.subf %21, %28 : vector<16x32xf32>
      %30 = arith.mulf %29, %29 : vector<16x32xf32>
      %cst_24 = arith.constant dense<0.000000e+00> : vector<16xf32>
      %31 = vector.multi_reduction <add>, %30, %cst_24 [1] : vector<16x32xf32> to vector<16xf32>
      %32 = vector.shape_cast %31 : vector<16xf32> to vector<16x1xf32>
      %cst_25 = arith.constant 3.200000e+01 : f32
      %33 = vector.broadcast %cst_25 : f32 to vector<16x1xf32>
      %34 = arith.divf %32, %33 : vector<16x1xf32>
      %35 = vector.broadcast %27 : vector<16x1xf32> to vector<16x32xf32>
      %36 = arith.subf %21, %35 : vector<16x32xf32>
      %cst_26 = arith.constant 9.99999974E-6 : f32
      %37 = vector.broadcast %cst_26 : f32 to vector<16x1xf32>
      %38 = arith.addf %34, %37 : vector<16x1xf32>
      %39 = math.rsqrt %38 : vector<16x1xf32>
      %40 = vector.broadcast %39 : vector<16x1xf32> to vector<16x32xf32>
      %41 = arith.mulf %36, %40 : vector<16x32xf32>
      %42 = vector.broadcast %22 : vector<1x32xf32> to vector<16x32xf32>
      %43 = arith.mulf %41, %42 : vector<16x32xf32>
      %44 = vector.broadcast %23 : vector<1x32xf32> to vector<16x32xf32>
      %45 = arith.addf %43, %44 : vector<16x32xf32>
      %46 = arith.truncf %45 : vector<16x32xf32> to vector<16x32xbf16>
      %c0_27 = arith.constant 0 : index
      %c0_28 = arith.constant 0 : index
      %47 = vector.load %arg10[%c0_27, %c0_28] : memref<16x32xbf16, #tpu.memory_space<vmem>>, vector<16x32xbf16>
      tpu.vector_store %arg10[%c0_27, %c0_28], %46 {strides = array<i32>} : memref<16x32xbf16, #tpu.memory_space<vmem>>, vector<16x32xbf16>,
      %cst_29 = arith.constant 0.000000e+00 : f32
      %48 = vector.broadcast %cst_29 : f32 to vector<16x32xf32>
      %c0_30 = arith.constant 0 : index
      %c0_31 = arith.constant 0 : index
      %49 = vector.load %arg11[%c0_30, %c0_31] : memref<16x32xf32, #tpu.memory_space<vmem>>, vector<16x32xf32>
      tpu.vector_store %arg11[%c0_30, %c0_31], %48 {strides = array<i32>} : memref<16x32xf32, #tpu.memory_space<vmem>>, vector<16x32xf32>,
    } else {
    }
    %c0 = arith.constant 0 : index
    %c0_1 = arith.constant 0 : index
    %3 = vector.load %arg10[%c0, %c0_1] : memref<16x32xbf16, #tpu.memory_space<vmem>>, vector<16x32xbf16>
    %c0_2 = arith.constant 0 : index
    %c0_3 = arith.constant 0 : index
    %4 = vector.load %arg5[%c0_2, %c0_3] : memref<32x64xbf16, #tpu.memory_space<vmem>>, vector<32x64xbf16>
    %cst = arith.constant dense<0.000000e+00> : vector<16x64xf32>
    %5 = tpu.matmul %3, %4, %cst {dimension_numbers = #tpu.dot_dimension_numbers<[1], [0], [0], [1], [0, 0, 1, 1], [], []>} : vector<16x32xbf16>, vector<32x64xbf16>, vector<16x64xf32> -> vector<16x64xf32>
    %c0_4 = arith.constant 0 : index
    %c0_5 = arith.constant 0 : index
    %6 = vector.load %arg6[%c0_4, %c0_5] : memref<1x64xf32, #tpu.memory_space<vmem>>, vector<1x64xf32>
    %7 = vector.broadcast %6 : vector<1x64xf32> to vector<16x64xf32>
    %8 = arith.addf %5, %7 : vector<16x64xf32>
    %cst_6 = arith.constant 0.000000e+00 : f32
    %9 = vector.broadcast %cst_6 : f32 to vector<16x64xf32>
    %10 = arith.maximumf %8, %9 : vector<16x64xf32>
    %c0_7 = arith.constant 0 : index
    %c0_8 = arith.constant 0 : index
    %11 = vector.load %arg11[%c0_7, %c0_8] : memref<16x32xf32, #tpu.memory_space<vmem>>, vector<16x32xf32>
    %12 = arith.truncf %10 : vector<16x64xf32> to vector<16x64xbf16>
    %c0_9 = arith.constant 0 : index
    %c0_10 = arith.constant 0 : index
    %13 = vector.load %arg7[%c0_9, %c0_10] : memref<64x32xbf16, #tpu.memory_space<vmem>>, vector<64x32xbf16>
    %cst_11 = arith.constant dense<0.000000e+00> : vector<16x32xf32>
    %14 = tpu.matmul %12, %13, %cst_11 {dimension_numbers = #tpu.dot_dimension_numbers<[1], [0], [0], [1], [0, 0, 1, 1], [], []>} : vector<16x64xbf16>, vector<64x32xbf16>, vector<16x32xf32> -> vector<16x32xf32>
    %15 = arith.addf %11, %14 : vector<16x32xf32>
    %c0_12 = arith.constant 0 : index
    %c0_13 = arith.constant 0 : index
    %16 = vector.load %arg11[%c0_12, %c0_13] : memref<16x32xf32, #tpu.memory_space<vmem>>, vector<16x32xf32>
    tpu.vector_store %arg11[%c0_12, %c0_13], %15 {strides = array<i32>} : memref<16x32xf32, #tpu.memory_space<vmem>>, vector<16x32xf32>,
    %c0_i32_14 = arith.constant 0 : i32
    %17 = arith.cmpi eq, %arg1, %c0_i32_14 : i32
    %18 = arith.extui %17 : i1 to i32
    %c0_i32_15 = arith.constant 0 : i32
    %19 = arith.cmpi ne, %18, %c0_i32_15 : i32
    scf.if %19 {
      %c0_16 = arith.constant 0 : index
      %c0_17 = arith.constant 0 : index
      %20 = vector.load %arg11[%c0_16, %c0_17] : memref<16x32xf32, #tpu.memory_space<vmem>>, vector<16x32xf32>
      %c0_18 = arith.constant 0 : index
      %c0_19 = arith.constant 0 : index
      %21 = vector.load %arg8[%c0_18, %c0_19] : memref<1x32xf32, #tpu.memory_space<vmem>>, vector<1x32xf32>
      %22 = vector.broadcast %21 : vector<1x32xf32> to vector<16x32xf32>
      %23 = arith.addf %20, %22 : vector<16x32xf32>
      %c0_20 = arith.constant 0 : index
      %c0_21 = arith.constant 0 : index
      %24 = vector.load %arg2[%c0_20, %c0_21] : memref<16x32xbf16, #tpu.memory_space<vmem>>, vector<16x32xbf16>
      %25 = arith.extf %24 : vector<16x32xbf16> to vector<16x32xf32>
      %26 = arith.addf %23, %25 : vector<16x32xf32>
      %c0_22 = arith.constant 0 : index
      %c0_23 = arith.constant 0 : index
      %27 = vector.load %arg9[%c0_22, %c0_23] : memref<16x32xf32, #tpu.memory_space<vmem>>, vector<16x32xf32>
      tpu.vector_store %arg9[%c0_22, %c0_23], %26 {strides = array<i32>} : memref<16x32xf32, #tpu.memory_space<vmem>>, vector<16x32xf32>,
    } else {
    }
    return
  }
  func.func @transform_0(%arg0: i32, %arg1: i32) -> (i32, i32) {
    %c0_i32 = arith.constant 0 : i32
    %c0_i32_0 = arith.constant 0 : i32
    return %arg0, %c0_i32 : i32, i32
  }
  func.func @transform_1(%arg0: i32, %arg1: i32) -> (i32, i32) {
    %c0_i32 = arith.constant 0 : i32
    %c0_i32_0 = arith.constant 0 : i32
    %c0_i32_1 = arith.constant 0 : i32
    return %c0_i32, %c0_i32_0 : i32, i32
  }
  func.func @transform_2(%arg0: i32, %arg1: i32) -> (i32, i32) {
    %c0_i32 = arith.constant 0 : i32
    %c0_i32_0 = arith.constant 0 : i32
    %c0_i32_1 = arith.constant 0 : i32
    return %c0_i32, %c0_i32_0 : i32, i32
  }
  func.func @transform_3(%arg0: i32, %arg1: i32) -> (i32, i32) {
    %c0_i32 = arith.constant 0 : i32
    %c0_i32_0 = arith.constant 0 : i32
    return %c0_i32, %arg1 : i32, i32
  }
  func.func @transform_4(%arg0: i32, %arg1: i32) -> (i32, i32) {
    %c0_i32 = arith.constant 0 : i32
    %c0_i32_0 = arith.constant 0 : i32
    return %c0_i32, %arg1 : i32, i32
  }
  func.func @transform_5(%arg0: i32, %arg1: i32) -> (i32, i32) {
    %c0_i32 = arith.constant 0 : i32
    %c0_i32_0 = arith.constant 0 : i32
    return %arg1, %c0_i32 : i32, i32
  }
  func.func @transform_6(%arg0: i32, %arg1: i32) -> (i32, i32) {
    %c0_i32 = arith.constant 0 : i32
    %c0_i32_0 = arith.constant 0 : i32
    %c0_i32_1 = arith.constant 0 : i32
    return %c0_i32, %c0_i32_0 : i32, i32
  }
  func.func @transform_7(%arg0: i32, %arg1: i32) -> (i32, i32) {
    %c0_i32 = arith.constant 0 : i32
    %c0_i32_0 = arith.constant 0 : i32
    return %arg0, %c0_i32 : i32, i32
  }
}

</mosaic_0001>

<bundles_post_ra>
// kernel: encoder_layer_fwd.3
= control target key start
LH: loop header
LB: loop body
LE: loop exit
PB: predicated region body
PF: predicated region fallthrough
CT: control target
= control target key end

     0   :  { %14 = vsyncpa [#allocation3], 0  ;;  %s468_s0 = inlined_call_operand.hbm [shape: f32[16,32], index: 0, kind: input, shape index: {}]   ;;  %s469_s1 = inlined_call_operand.vmem [shape: f32[1,32], index: 1, kind: input, shape index: {}]   ;;  %s470_s2 = inlined_call_operand.vmem [shape: f32[1,32], index: 2, kind: input, shape index: {}]   ;;  %s471_s3 = inlined_call_operand.vmem [shape: bf16[32,32], index: 3, kind: input, shape index: {}]   ;;  %s472_s4 = inlined_call_operand.vmem [shape: f32[1,32], index: 4, kind: input, shape index: {}]   ;;  %s473_s5 = inlined_call_operand.hbm [shape: bf16[32,64], index: 5, kind: input, shape index: {}]   ;;  %s474_s6 = inlined_call_operand.vmem [shape: f32[1,64], index: 6, kind: input, shape index: {}]   ;;  %s475_s7 = inlined_call_operand.vmem [shape: bf16[16,32], index: 7, kind: output, shape index: {0}]   ;;  %s476_s8 = inlined_call_operand.vmem [shape: bf16[16,64], index: 8, kind: output, shape index: {1}]  }
   0x1   :  { %15 = vsyncpa [#allocation5], 0  ;;  %s369_s27 = smov [#allocation2]  }
   0x2   :  { %s21_s28 = sshll.u32 %s369_s27, 4  ;;  %s22_s28 = int_to_ptr.vmem [resolvable:$true] %s21_s28 }
   0x3   :  { %s333_s29 = scalar_lea.vmem %s22_s28, 256  ;;  %p338_p1 = scmp.lt.s32.totalorder %s22_s28, %s22_s28 }
   0x4   :  { %p334_p0 = scmp.ne.s32.totalorder %s22_s28, %s333_s29  ;;  %p339_p2 = scmp.lt.s32.totalorder %s333_s29, %s333_s29 }
   0x6   :  { %p340_p3 = por %p339_p2, %p338_p1 }
   0x8   :  { %p341_p4 = pnand %p340_p3, %p334_p0 }
   0xa   :  { %344 = shalt.err (!%p341_p4)
}
   0xb   :  { %s370_s30 = smov 128   ;;  %s371_s9 = smov 8  }
   0xc   :  { %27 = dma.hbm_to_vmem [thread:$0]  %s468_s0, 256, %s22_s28, [#allocation3], %s370_s30, %s370_s30, %s371_s9  }
   0xd   :  { %s372_s12 = smov [#allocation4]  }
   0xe   :  { %s41_s13 = sshll.u32 %s372_s12, 4  ;;  %s42_s13 = int_to_ptr.vmem [resolvable:$true] %s41_s13 }
   0xf   :  { %s353_s14 = scalar_lea.vmem %s42_s13, 256  ;;  %p358_p6 = scmp.lt.s32.totalorder %s42_s13, %s42_s13 }
  0x10   :  { %p354_p5 = scmp.ne.s32.totalorder %s42_s13, %s353_s14  ;;  %p359_p7 = scmp.lt.s32.totalorder %s353_s14, %s353_s14 }
  0x12   :  { %p360_p8 = por %p359_p7, %p358_p6 }
  0x14   :  { %p361_p9 = pnand %p360_p8, %p354_p5 }
  0x16   :  { %364 = shalt.err (!%p361_p9)
}
  0x17   :  { %s373_s15 = smov 64   ;;  %s374_s16 = smov 4  }
  0x18   :  { %47 = dma.hbm_to_vmem [thread:$0]  %s473_s5, 256, %s42_s13, [#allocation5], %s373_s15, %s373_s15, %s374_s16  }
  0x19   :  { %365 = dma.done.wait [#allocation3], 256  }
  0x1a   :  { %366 = vsyncadd [#allocation3], 4294967040 }
  0x1b   :  { %367 = dma.done.wait [#allocation5], 256  }
  0x1c   :  { %368 = vsyncadd [#allocation5], 4294967040  ;;  %vm61_vm0 = vcmask 261120   ;;  %v57_v0 = vld [vmem:[#allocation2] sm:$0xff]  ;;  %v58_v1 = vld [vmem:[#allocation2 + $0x8] sm:$0xff]  ;;  %v375_v16 = vmov 0.0  }
  0x1d   :  { %v62_v2 = vsel %vm61_vm0, %v57_v0, 0.0  ;;  %v65_v3 = vsel %vm61_vm0, %v58_v1, 0.0  ;;  %v317_v14 = vld [vmem:[%s471_s3 + $0x8] sm:$0xff]   ;;  %v318_v15 = vld [vmem:[#allocation4 + $0x8] sm:$0xff]   ;;  %293 = vmatprep.subr.bf16.mxu0 %v375_v16  ;;  %301 = vmatprep.subr.bf16.mxu1 %v375_v16  ;;  %v319_v17 = vld [vmem:[%s471_s3] sm:$0xff]   ;;  %vm376_vm1 = vmmov 0  }
  0x1e   :  { %63 = vadd.xlane.f32.xlu0 %v62_v2  ;;  %294 = vmatpush3.bf16.msra.mxu0 %v317_v14  ;;  %v320_v18 = vld [vmem:[#allocation4] sm:$0xff]   ;;  %v269_v27 = vld [vmem:[%s469_s1] ss:$0 sm:$0xff]  ;;  %vm181_vm2 = vcmask 257024   ;;  %vm256_vm3 = vcmask 519168  }
  0x1f   :  { %302 = vmatpush3.bf16.msra.mxu1 %v318_v15  ;;  %295 = vmatprep.subr.bf16.mxu0 %v375_v16  ;;  %v270_v31 = vld [vmem:[%s470_s2] ss:$0 sm:$0xff] }
  0x20   :  { %303 = vmatprep.subr.bf16.mxu1 %v375_v16  ;;  %297 = vmatprep.mubr.msk.bf16.mxu0 %vm376_vm1, %v375_v16  ;;  %v271_v36 = vld [vmem:[%s472_s4] ss:$0 sm:$0xff] }
  0x21   :  { %305 = vmatprep.mubr.msk.bf16.mxu1 %vm376_vm1, %v375_v16  ;;  %v277_v37 = vld [vmem:[%s474_s6] ss:$0 sm:$0xff] }
  0x22   :  { %66 = vadd.xlane.f32.xlu0 %v65_v3  ;;  %296 = vmatpush3.bf16.msra.mxu0 %v319_v17 }
  0x23   :  { %304 = vmatpush3.bf16.msra.mxu1 %v320_v18 }
  0xa7   :  { %v64_v4 = vpop.xlane.xlu0 %63 }
  0xa8   :  { %v69_v5 = vmul.f32 0.03125, %v64_v4 }
  0xaa   :  { %v71_v6 = vsub.f32 %v57_v0, %v69_v5 }
  0xab   :  { %v67_v7 = vpop.xlane.xlu0 %66 }
  0xac   :  { %v70_v8 = vmul.f32 0.03125, %v67_v7  ;;  %v73_v9 = vmul.f32 %v71_v6, %v71_v6 }
  0xae   :  { %v72_v10 = vsub.f32 %v58_v1, %v70_v8  ;;  %v75_v11 = vsel %vm61_vm0, %v73_v9, 0.0 }
  0xaf   :  { %76 = vadd.xlane.f32.xlu1 %v75_v11 }
  0xb0   :  { %v74_v12 = vmul.f32 %v72_v10, %v72_v10 }
  0xb2   :  { %v78_v13 = vsel %vm61_vm0, %v74_v12, 0.0 }
  0xb3   :  { %79 = vadd.xlane.f32.xlu1 %v78_v13 }
 0x138   :  { %v77_v19 = vpop.xlane.xlu1 %76 }
 0x139   :  { %v81_v20 = vmul.f32 0.03125, %v77_v19 }
 0x13b   :  { %v83_v21 = vadd.f32 1e-05, %v81_v20 }
 0x13c   :  { %v80_v22 = vpop.xlane.xlu1 %79 }
 0x13d   :  { %321 = vrsqrt.f32 %v83_v21  ;;  %v82_v23 = vmul.f32 0.03125, %v80_v22 }
 0x13f   :  { %v84_v24 = vadd.f32 1e-05, %v82_v23 }
 0x141   :  { %323 = vrsqrt.f32 %v84_v24 }
 0x14a   :  { %v322_v25 = vpop.eup %321 }
 0x14b   :  { %v87_v26 = vmul.f32 %v322_v25, %v71_v6 }
 0x14d   :  { %v95_v30 = vmul.f32 %v269_v27, %v87_v26 }
 0x14e   :  { %v324_v28 = vpop.eup %323 }
 0x14f   :  { %v88_v29 = vmul.f32 %v324_v28, %v72_v10  ;;  %v103_v33 = vadd.f32 %v270_v31, %v95_v30 }
 0x151   :  { %v96_v32 = vmul.f32 %v269_v27, %v88_v29 }
 0x153   :  { %v104_v34 = vadd.f32 %v270_v31, %v96_v32 }
 0x155   :  { %v105_v35 = vpack.c.bf16 %v104_v34, %v103_v33 }
 0x157   :  { %298 = vmatmul.mubr.msk.bf16.vlgmr.msra.gmra.mxu0 %vm61_vm0, %v105_v35  ;;  %306 = vmatmul.mubr.msk.bf16.vlgmr.msra.gmra.mxu1 %vm61_vm0, %v105_v35 }
 0x217   :  { %v166_v38 = vpop.f32.mrf.mxu0  ;;  %v241_v39 = vpop.f32.mrf.mxu1 }
 0x218   :  { %v167_v40 = vadd.f32 %v271_v36, %v166_v38  ;;  %v242_v41 = vadd.f32 %v277_v37, %v241_v39 }
 0x219   :  { %v299_v42 = vpop.f32.mrf.mxu0  ;;  %v307_v43 = vpop.f32.mrf.mxu1 }
 0x21a   :  { %v283_v44 = vpack.c.bf16 %v167_v40, %v167_v40  ;;  %v285_v45 = vpack.c.bf16 %v242_v41, %v242_v41 }
 0x21b   :  { %v169_v46 = vpop.f32.mrf.mxu0  ;;  %v244_v47 = vpop.f32.mrf.mxu1 }
 0x21c   :  { %182 = vst.msk [vmem:[%s475_s7] sm:$0xf] %vm181_vm2, %v283_v44  ;;  %v170_v48 = vadd.f32 %v271_v36, %v169_v46  ;;  %v245_v49 = vadd.f32 %v277_v37, %v244_v47 }
 0x21d   :  { %257 = vst.msk [vmem:[%s476_s8] sm:$0xf] %vm256_vm3, %v285_v45  ;;  %v300_v50 = vpop.f32.mrf.mxu0  ;;  %v308_v51 = vpop.f32.mrf.mxu1 }
 0x21e   :  { %v284_v52 = vpack.c.bf16 %v170_v48, %v170_v48  ;;  %v286_v53 = vpack.c.bf16 %v245_v49, %v245_v49 }
 0x220   :  { %183 = vst.msk [vmem:[%s475_s7 + $0x4] sm:$0xf] %vm181_vm2, %v284_v52 }
 0x221   :  { %258 = vst.msk [vmem:[%s476_s8 + $0x4] sm:$0xf] %vm256_vm3, %v286_v53 }
 0x222   :  { %267 = vsyncpa [#allocation3], 1 }
 0x223   :  { %268 = vsyncpa [#allocation5], 1 }

// kernel: encoder_layer_fwd.5
= control target key start
LH: loop header
LB: loop body
LE: loop exit
PB: predicated region body
PF: predicated region fallthrough
CT: control target
= control target key end

     0   :  { %vm38_vm0 = vcmask 261120   ;;  %s487_s0 = inlined_call_operand.vmem [shape: bf16[16,32], index: 0, kind: input, shape index: {}]   ;;  %s488_s1 = inlined_call_operand.vmem [shape: f32[1,32], index: 1, kind: input, shape index: {}]   ;;  %s489_s2 = inlined_call_operand.vmem [shape: f32[1,32], index: 2, kind: input, shape index: {}]   ;;  %s490_s3 = inlined_call_operand.vmem [shape: bf16[32,64], index: 3, kind: input, shape index: {}]   ;;  %s491_s4 = inlined_call_operand.vmem [shape: f32[1,64], index: 4, kind: input, shape index: {}]   ;;  %s492_s5 = inlined_call_operand.vmem [shape: bf16[64,32], index: 5, kind: input, shape index: {}]   ;;  %s493_s6 = inlined_call_operand.vmem [shape: f32[1,32], index: 6, kind: input, shape index: {}]   ;;  %s494_s7 = inlined_call_operand.hbm [shape: f32[16,32], index: 7, kind: output, shape index: {}]  }
   0x1   :  { %v312_v0 = vld [vmem:[%s487_s0] sm:$0xff]  }
   0x2   :  { %v433_v1 = vunpack.c.l.bf16 %v312_v0  ;;  %v435_v2 = vunpack.c.h.bf16 %v312_v0 }
   0x4   :  { %v39_v3 = vsel %vm38_vm0, %v433_v1, 0.0 }
   0x5   :  { %40 = vadd.xlane.f32.xlu0 %v39_v3 }
   0x6   :  { %12 = vsyncpa [#allocation5], 0  ;;  %v42_v4 = vsel %vm38_vm0, %v435_v2, 0.0  ;;  %v352_v15 = vld [vmem:[%s490_s3 + $0x8] sm:$0xff]   ;;  %v385_v16 = vmov 0.0   ;;  %vm386_vm1 = vmmov 0  }
   0x7   :  { %327 = vmatprep.subr.bf16.mxu0 %v385_v16  ;;  %93 = vst.msk [vmem:[#allocation3] sm:$0xff] %vm38_vm0, %v385_v16  ;;  %94 = vst.msk [vmem:[#allocation3 + $0x8] sm:$0xff] %vm38_vm0, %v385_v16  ;;  %331 = vmatprep.mubr.msk.bf16.mxu0 %vm386_vm1, %v385_v16  ;;  %v353_v17 = vld [vmem:[%s490_s3] sm:$0xff]   ;;  %v355_v18 = vld [vmem:[%s492_s5 + $0x18] sm:$0xff]   ;;  %vm90_vm2 = vcmask 257024   ;;  %vm207_vm3 = vcmask 523264  }
   0x8   :  { %328 = vmatpush3.bf16.msra.mxu0 %v352_v15  ;;  %335 = vmatprep.subr.bf16.mxu1 %v385_v16  ;;  %v294_v26 = vld [vmem:[%s488_s1] ss:$0 sm:$0xff]  ;;  %v356_v38 = vld [vmem:[%s492_s5 + $0x10] sm:$0xff]   ;;  %v357_v39 = vld [vmem:[%s492_s5 + $0x8] sm:$0xff]   ;;  %s387_s17 = smov [#allocation4]  }
   0x9   :  { %43 = vadd.xlane.f32.xlu0 %v42_v4  ;;  %329 = vmatprep.subr.bf16.mxu0 %v385_v16  ;;  %v295_v28 = vld [vmem:[%s489_s2] ss:$0 sm:$0xff]  ;;  %s283_s18 = sshll.u32 %s387_s17, 4  ;;  %s284_s18 = int_to_ptr.vmem [resolvable:$true] %s283_s18 }
   0xa   :  { %343 = vmatprep.mubr.msk.bf16.mxu1 %vm386_vm1, %v385_v16  ;;  %336 = vmatpush3.bf16.msra.mxu1 %v355_v18  ;;  %v358_v40 = vld [vmem:[%s492_s5] sm:$0xff]   ;;  %s363_s19 = scalar_lea.vmem %s284_s18, 256  ;;  %p368_p1 = scmp.lt.s32.totalorder %s284_s18, %s284_s18 }
   0xb   :  { %337 = vmatprep.subr.bf16.mxu1 %v385_v16  ;;  %v298_v41 = vld [vmem:[%s491_s4] ss:$0 sm:$0xff]  ;;  %p364_p0 = scmp.ne.s32.totalorder %s284_s18, %s363_s19  ;;  %p369_p2 = scmp.lt.s32.totalorder %s363_s19, %s363_s19 }
   0xc   :  { %330 = vmatpush3.bf16.msra.mxu0 %v353_v17  ;;  %v308_v59 = vld [vmem:[%s493_s6] ss:$0 sm:$0xff] }
   0xd   :  { %p370_p3 = por %p369_p2, %p368_p1 }
   0xe   :  { %338 = vmatpush3.bf16.msra.mxu1 %v356_v38  ;;  %v172_v51 = vld [vmem:[#allocation3] sm:$0xff]  ;;  %v173_v55 = vld [vmem:[#allocation3 + $0x8] sm:$0xff] }
   0xf   :  { %339 = vmatprep.subr.bf16.mxu1 %v385_v16  ;;  %p371_p4 = pnand %p370_p3, %p364_p0 }
  0x12   :  { %340 = vmatpush3.bf16.msra.mxu1 %v357_v39 }
  0x13   :  { %341 = vmatprep.subr.bf16.mxu1 %v385_v16 }
  0x16   :  { %342 = vmatpush3.bf16.msra.mxu1 %v358_v40 }
  0x8e   :  { %v41_v5 = vpop.xlane.xlu0 %40 }
  0x8f   :  { %v46_v6 = vmul.f32 0.03125, %v41_v5 }
  0x91   :  { %v48_v7 = vsub.f32 %v433_v1, %v46_v6 }
  0x92   :  { %v44_v8 = vpop.xlane.xlu0 %43 }
  0x93   :  { %v47_v9 = vmul.f32 0.03125, %v44_v8  ;;  %v50_v10 = vmul.f32 %v48_v7, %v48_v7 }
  0x95   :  { %v49_v11 = vsub.f32 %v435_v2, %v47_v9  ;;  %v52_v12 = vsel %vm38_vm0, %v50_v10, 0.0 }
  0x96   :  { %53 = vadd.xlane.f32.xlu1 %v52_v12 }
  0x97   :  { %v51_v13 = vmul.f32 %v49_v11, %v49_v11 }
  0x99   :  { %v55_v14 = vsel %vm38_vm0, %v51_v13, 0.0 }
  0x9a   :  { %56 = vadd.xlane.f32.xlu1 %v55_v14 }
 0x11f   :  { %v54_v19 = vpop.xlane.xlu1 %53 }
 0x120   :  { %v58_v20 = vmul.f32 0.03125, %v54_v19 }
 0x122   :  { %v60_v21 = vadd.f32 1e-05, %v58_v20 }
 0x123   :  { %v57_v22 = vpop.xlane.xlu1 %56 }
 0x124   :  { %359 = vrsqrt.f32 %v60_v21  ;;  %v59_v23 = vmul.f32 0.03125, %v57_v22 }
 0x126   :  { %v61_v24 = vadd.f32 1e-05, %v59_v23 }
 0x128   :  { %361 = vrsqrt.f32 %v61_v24 }
 0x131   :  { %v360_v25 = vpop.eup %359 }
 0x132   :  { %v64_v27 = vmul.f32 %v360_v25, %v48_v7 }
 0x134   :  { %v72_v29 = vmul.f32 %v294_v26, %v64_v27 }
 0x135   :  { %v362_v30 = vpop.eup %361 }
 0x136   :  { %v80_v31 = vadd.f32 %v295_v28, %v72_v29  ;;  %v65_v32 = vmul.f32 %v362_v30, %v49_v11 }
 0x138   :  { %v309_v33 = vpack.c.bf16 %v80_v31, %v80_v31  ;;  %v73_v34 = vmul.f32 %v294_v26, %v65_v32 }
 0x13a   :  { %91 = vst.msk [vmem:[#allocation2] sm:$0xf] %vm90_vm2, %v309_v33  ;;  %v81_v35 = vadd.f32 %v295_v28, %v73_v34 }
 0x13c   :  { %v310_v36 = vpack.c.bf16 %v81_v35, %v81_v35 }
 0x13e   :  { %92 = vst.msk [vmem:[#allocation2 + $0x4] sm:$0xf] %vm90_vm2, %v310_v36 }
 0x145   :  { %v354_v37 = vld [vmem:[#allocation2] sm:$0xff]  }
 0x146   :  { %332 = vmatmul.mubr.msk.bf16.vlgmr.msra.gmra.mxu0 %vm38_vm0, %v354_v37 }
 0x206   :  { %v163_v42 = vpop.f32.mrf.mxu0 }
 0x207   :  { %v164_v44 = vadd.f32 %v298_v41, %v163_v42 }
 0x208   :  { %v333_v43 = vpop.f32.mrf.mxu0 }
 0x209   :  { %v170_v48 = vmax.f32 %v164_v44, 0.0 }
 0x20a   :  { %v166_v45 = vpop.f32.mrf.mxu0 }
 0x20b   :  { %v167_v46 = vadd.f32 %v298_v41, %v166_v45 }
 0x20c   :  { %v334_v47 = vpop.f32.mrf.mxu0 }
 0x20d   :  { %v171_v49 = vmax.f32 %v167_v46, 0.0 }
 0x20f   :  { %v174_v50 = vpack.c.bf16 %v171_v49, %v170_v48 }
 0x211   :  { %344 = vmatmul.mubr.msk.bf16.vlgmr.msra.gmra.mxu1 %vm207_vm3, %v174_v50 }
 0x2d1   :  { %v245_v52 = vpop.f32.mrf.mxu1 }
 0x2d2   :  { %v252_v53 = vadd.f32 %v245_v52, %v172_v51 }
 0x2d3   :  { %v345_v54 = vpop.f32.mrf.mxu1 }
 0x2d4   :  { %254 = vst.msk [vmem:[#allocation3] sm:$0xff] %vm38_vm0, %v252_v53 }
 0x2d5   :  { %v248_v56 = vpop.f32.mrf.mxu1 }
 0x2d6   :  { %v253_v57 = vadd.f32 %v248_v56, %v173_v55 }
 0x2d7   :  { %v346_v58 = vpop.f32.mrf.mxu1 }
 0x2d8   :  { %255 = vst.msk [vmem:[#allocation3 + $0x8] sm:$0xff] %vm38_vm0, %v253_v57 }
 0x2db   :  { %v259_v60 = vld [vmem:[#allocation3] sm:$0xff] }
 0x2dc   :  { %v268_v61 = vadd.f32 %v308_v59, %v259_v60 }
 0x2de   :  { %v274_v62 = vadd.f32 %v433_v1, %v268_v61 }
 0x2df   :  { %v260_v63 = vld [vmem:[#allocation3 + $0x8] sm:$0xff] }
 0x2e0   :  { %v269_v0 = vadd.f32 %v308_v59, %v260_v63  ;;  %276 = vst.msk [vmem:[#allocation4] sm:$0xff] %vm38_vm0, %v274_v62 }
 0x2e2   :  { %v275_v3 = vadd.f32 %v435_v2, %v269_v0 }
 0x2e4   :  { %277 = vst.msk [vmem:[#allocation4 + $0x8] sm:$0xff] %vm38_vm0, %v275_v3 }
 0x2e5   :  { %374 = shalt.err (!%p371_p4)
}
 0x2e6   :  { %s388_s6 = smov 128   ;;  %s389_s20 = smov 8  }
 0x2e7   :  { %289 = dma.vmem_to_hbm [thread:$0]  %s284_s18, 256, %s494_s7, [#allocation5], %s388_s6, %s388_s6, %s389_s20  }
 0x2e8   :  { %383 = dma.done.wait [#allocation5], 256  }
 0x2e9   :  { %384 = vsyncadd [#allocation5], 4294967040 }
 0x2ea   :  { %293 = vsyncpa [#allocation5], 1 }

// kernel: encoder_layer_fwd.4
= control target key start
LH: loop header
LB: loop body
LE: loop exit
PB: predicated region body
PF: predicated region fallthrough
CT: control target
= control target key end

     0   :  { %s1338_s21 = smov 0   ;;  %s1340_s22 = smov 0   ;;  %s1498_s0 = inlined_call_operand.vmem [shape: bf16[16,32], index: 0, kind: input, shape index: {}]   ;;  %s1499_s1 = inlined_call_operand.vmem [shape: bf16[16,64], index: 1, kind: input, shape index: {}]   ;;  %s1500_s2 = inlined_call_operand.vmem [shape: f32[8,8], index: 2, kind: input, shape index: {}]   ;;  %s1501_s3 = inlined_call_operand.vmem [shape: f32[16,32], index: 3, kind: input, shape index: {}]   ;;  %s1502_s4 = inlined_call_operand.vmem [shape: bf16[32,32], index: 4, kind: input, shape index: {}]   ;;  %s1503_s5 = inlined_call_operand.vmem [shape: f32[1,32], index: 5, kind: input, shape index: {}]   ;;  %s1504_s6 = inlined_call_operand.vmem [shape: bf16[16,32], index: 6, kind: output, shape index: {}]  }
   0x1   :  { %s1342_s23 = smov 0  }
   0x2 LB: > { %s28_s24 = sadd.s32 1, %s1288_s22  ;;  %p1101_p0 = scmp.ge.s32.totalorder %s1292_s23, 1  ;;  %s1292_s23 = sphi %s1342_s23, %s16_s23   ;;  %s1288_s22 = sphi %s1340_s22, %s1506_s22   ;;  %s1284_s21 = sphi %s1338_s21, %s1505_s21  }
   0x3   : > { %p30_p1 = scmp.ge.s32.totalorder %s28_s24, 2  ;;  %p260_p2 = scmp.lt.s32.totalorder %s1292_s23, 3 }
   0x5   : > { %s1508_s24 = smov (%p30_p1, %s28_s24), 0  ;;  %p261_p3 = pnand %p1101_p0, %p260_p2 }
   0x6   : > { %p304_p4 = scmp.lt.s32.totalorder (!%p261_p3), %s1284_s21, 1  ;;  %s1296_s10 = smov (!%p261_p3), 96  }
   0x7   : > { %264 = sbr.rel (%p261_p3) target bundleno = 2684 (0xa7c), region = 44  ;;  %s1297_s11 = smov (!%p261_p3), 120  }
   0x8   : > { %s1298_s12 = smov (!%p261_p3), 88   ;;  %s1299_s15 = smov (!%p261_p3), 112  }
   0x9   : > { %s1300_s18 = smov (!%p261_p3), 80   ;;  %s1301_s19 = smov (!%p261_p3), 104  }
   0xa   : > { %s1302_s27 = smov (!%p261_p3), 72  }
   0xc   : > { %v1294_v0 = vmov 0.0   ;;  %vm1295_vm0 = vmmov 0   ;;  %s1510_s21 = smov (!%p304_p4, %s1284_s21), 1  ;;  %vm337_vm1 = vcmask 64512   ;;  %v1383_v5 = vld [vmem:[%s1500_s2] sm:$0xff]  ;;  %vm406_vm2 = vcmask 1043456  }
   0xd   : > { %1147 = vmatprep.subr.bf16.mxu0 %v1294_v0  ;;  %1149 = vmatprep.mubr.msk.bf16.mxu0 %vm1295_vm0, %v1294_v0  ;;  %s1365_s25 = sshll.u32 %s1510_s21, 2  ;;  %v334_v46 = vld [vmem:[%s1502_s4 + $0x4] sm:$0xf]  ;;  %v333_v50 = vld [vmem:[%s1502_s4] sm:$0xf]  ;;  %s1104_s30 = sshll.u32 %s1510_s21, 3 }
   0xe   : > { %1153 = vmatprep.subr.bf16.mxu1 %v1294_v0  ;;  %1155 = vmatprep.mubr.msk.bf16.mxu1 %vm1295_vm0, %v1294_v0  ;;  %s312_s28 = scalar_lea.vmem %s1499_s1, %s1365_s25  ;;  %s307_s7 = scalar_lea.vmem %s1498_s0, %s1365_s25  ;;  %v571_v47 = vsel %vm406_vm2, %v334_v46, 0  ;;  %v617_v53 = vsel %vm406_vm2, %v333_v50, 0  ;;  %vm990_vm3 = vcmask 257024  }
   0xf   : > { %v331_v1 = vld [vmem:[%s312_s28] sm:$0xf]  ;;  %s321_s9 = scalar_lea.vmem %s1501_s3, %s1104_s30  ;;  %s327_s14 = scalar_lea.vmem %s1504_s6, %s1365_s25 }
  0x10   : > { %v342_v2 = vsel %vm337_vm1, %v331_v1, 0  ;;  %v330_v3 = vld [vmem:[%s307_s7] sm:$0xf]  ;;  %v1387_v12 = vcombine.low %v331_v1, %v331_v1 }
  0x11   : > { %1148 = vmatpush3.bf16.xpose.msra.mxu0 %v342_v2  ;;  %v1394_v20 = vcombine.low %v330_v3, %v330_v3 }
  0x12   : > { %1165 = vmatprep.subr.bf16.mxu0 %v1294_v0  ;;  %401 = vrot.lane.b32.xlu1 %v1387_v12, %s1296_s10 }
  0x16   : > { %456 = vrot.lane.b32.xlu1 %v1387_v12, %s1297_s11 }
  0x18   : > { %1150 = vmatmul.mubr.msk.bf16.vlgmr.msra.gmra.mxu0 %vm337_vm1, %v330_v3 }
  0x19   : > { %1167 = vmatprep.mubr.msk.bf16.mxu0 %vm1295_vm0, %v1294_v0 }
  0x84   : > { %v402_v18 = vpop.permute.xlu1 %401 }
  0x85   : > { %v408_v19 = vsel %vm406_vm2, %v402_v18, 0 }
  0x86   : > { %1154 = vmatpush3.bf16.msra.mxu1 %v408_v19 }
  0x87   : > { %1159 = vmatprep.subr.bf16.mxu1 %v1294_v0 }
  0x88   : > { %v457_v23 = vpop.permute.xlu1 %456 }
  0x89   : > { %v462_v25 = vsel %vm337_vm1, %v457_v23, 0 }
  0xd8   : > { %v378_v4 = vpop.f32.mrf.mxu0 }
  0xd9   : > { %v384_v6 = vmul.f32 0.35355338, %v378_v4 }
  0xda   : > { %v1151_v7 = vpop.f32.mrf.mxu0 }
  0xdb   : > { %v385_v8 = vadd.f32 %v384_v6, %v1383_v5 }
  0xdc   : > { %v381_v9 = vpop.f32.mrf.mxu0 }
  0xdd   : > { %v386_v10 = vsel %vm337_vm1, %v385_v8, -inf }
  0xde   : > { %387 = vmax.xlane.f32.xlu0 %v386_v10  ;;  %v1152_v11 = vpop.f32.mrf.mxu0 }
 0x167   : > { %v388_v13 = vpop.xlane.xlu0 %387 }
 0x168   : > { %v389_v14 = vsub.f32 %v385_v8, %v388_v13 }
 0x16a   : > { %v390_v15 = vmul.f32 1.442695, %v389_v14 }
 0x16c   : > { %1254 = vpow2.f32 %v390_v15 }
 0x179   : > { %v1255_v16 = vpop.eup %1254 }
 0x17a   : > { %v392_v17 = vsel %vm337_vm1, %v1255_v16, 0.0 }
 0x17b   : > { %393 = vadd.xlane.f32.xlu0 %v392_v17 }
 0x191   : > { %454 = vrot.lane.b32.xlu0 %v1394_v20, %s1297_s11 }
 0x204   : > { %v394_v21 = vpop.xlane.xlu0 %393 }
 0x205   : > { %1256 = vrcp.f32 %v394_v21 }
 0x208   : > { %v455_v27 = vpop.permute.xlu0 %454 }
 0x212   : > { %v1257_v22 = vpop.eup %1256 }
 0x213   : > { %v396_v24 = vmul.f32 %v1257_v22, %v1255_v16 }
 0x215   : > { %v397_v26 = vpack.c.bf16 %v396_v24, %v396_v24 }
 0x217   : > { %1156 = vmatmul.mubr.msk.bf16.vlgmr.msra.gmra.mxu1 %vm337_vm1, %v397_v26 }
 0x218   : > { %1160 = vmatpush3.bf16.xpose.msra.mxu1 %v462_v25  ;;  %1161 = vmatprep.mubr.msk.bf16.mxu1 %vm1295_vm0, %v1294_v0 }
 0x219   : > { %1171 = vmatprep.subr.bf16.mxu1 %v1294_v0 }
 0x21f   : > { %1162 = vmatmul.mubr.msk.bf16.vlgmr.msra.gmra.mxu1 %vm337_vm1, %v455_v27 }
 0x220   : > { %1173 = vmatprep.mubr.msk.bf16.mxu1 %vm1295_vm0, %v1294_v0  ;;  %1172 = vmatpush3.bf16.msra.mxu1 %v571_v47 }
 0x221   : > { %1183 = vmatprep.subr.bf16.mxu1 %v1294_v0 }
 0x2d7   : > { %v444_v28 = vpop.f32.mrf.mxu1 }
 0x2d8   : > { %v450_v54 = vpack.c.bf16 %v444_v28, %v444_v28 }
 0x2d9   : > { %v1157_v29 = vpop.f32.mrf.mxu1 }
 0x2db   : > { %v447_v30 = vpop.f32.mrf.mxu1 }
 0x2dd   : > { %v1158_v31 = vpop.f32.mrf.mxu1 }
 0x2de   : > { %v335_v31 = vld [vmem:[%s1502_s4 + $0x8] sm:$0xf] }
 0x2df   : > { %v498_v32 = vpop.f32.mrf.mxu1 }
 0x2e0   : > { %v504_v33 = vmul.f32 0.35355338, %v498_v32  ;;  %v776_v32 = vsel %vm406_vm2, %v335_v31, 0 }
 0x2e1   : > { %v1163_v34 = vpop.f32.mrf.mxu1 }
 0x2e2   : > { %v505_v35 = vadd.f32 %v504_v33, %v1383_v5 }
 0x2e3   : > { %v501_v36 = vpop.f32.mrf.mxu1 }
 0x2e4   : > { %v506_v37 = vsel %vm337_vm1, %v505_v35, -inf }
 0x2e5   : > { %507 = vmax.xlane.f32.xlu1 %v506_v37  ;;  %v1164_v38 = vpop.f32.mrf.mxu1 }
 0x2f6   : > { %518 = vrot.lane.b32.xlu1 %v1387_v12, %s1298_s12 }
 0x2fa   : > { %659 = vrot.lane.b32.xlu1 %v1394_v20, %s1299_s15 }
 0x36e   : > { %v508_v39 = vpop.xlane.xlu1 %507 }
 0x36f   : > { %v509_v40 = vsub.f32 %v505_v35, %v508_v39 }
 0x371   : > { %v510_v41 = vmul.f32 1.442695, %v509_v40 }
 0x372   : > { %v519_v44 = vpop.permute.xlu1 %518 }
 0x373   : > { %1258 = vpow2.f32 %v510_v41  ;;  %v524_v45 = vsel %vm406_vm2, %v519_v44, 0 }
 0x374   : > { %1166 = vmatpush3.bf16.msra.mxu0 %v524_v45 }
 0x375   : > { %1177 = vmatprep.subr.bf16.mxu0 %v1294_v0 }
 0x376   : > { %v660_v63 = vpop.permute.xlu1 %659 }
 0x380   : > { %v1259_v42 = vpop.eup %1258 }
 0x381   : > { %v512_v43 = vsel %vm337_vm1, %v1259_v42, 0.0 }
 0x382   : > { %513 = vadd.xlane.f32.xlu0 %v512_v43 }
 0x398   : > { %661 = vrot.lane.b32.xlu0 %v1387_v12, %s1299_s15 }
 0x40b   : > { %v514_v48 = vpop.xlane.xlu0 %513 }
 0x40c   : > { %1260 = vrcp.f32 %v514_v48 }
 0x40f   : > { %v662_v55 = vpop.permute.xlu0 %661 }
 0x410   : > { %v667_v58 = vsel %vm337_vm1, %v662_v55, 0 }
 0x419   : > { %v1261_v49 = vpop.eup %1260 }
 0x41a   : > { %v516_v51 = vmul.f32 %v1261_v49, %v1259_v42 }
 0x41c   : > { %v517_v52 = vpack.c.bf16 %v516_v51, %v516_v51 }
 0x41e   : > { %1168 = vmatmul.mubr.msk.bf16.vlgmr.msra.gmra.mxu0 %vm337_vm1, %v517_v52 }
 0x41f   : > { %1178 = vmatpush3.bf16.msra.mxu0 %v617_v53  ;;  %1179 = vmatprep.mubr.msk.bf16.mxu0 %vm1295_vm0, %v1294_v0 }
 0x420   : > { %1189 = vmatprep.subr.bf16.mxu0 %v1294_v0 }
 0x426   : > { %1180 = vmatmul.mubr.msk.bf16.vlgmr.msra.gmra.mxu0 %vm337_vm1, %v450_v54 }
 0x427   : > { %1191 = vmatprep.mubr.msk.bf16.mxu0 %vm1295_vm0, %v1294_v0 }
 0x4de   : > { %v560_v56 = vpop.f32.mrf.mxu0 }
 0x4df   : > { %v566_v57 = vpack.c.bf16 %v560_v56, %v560_v56 }
 0x4e0   : > { %v1169_v59 = vpop.f32.mrf.mxu0 }
 0x4e1   : > { %1174 = vmatmul.mubr.msk.bf16.vlgmr.msra.gmra.mxu1 %vm337_vm1, %v566_v57 }
 0x4e2   : > { %1184 = vmatpush3.bf16.xpose.msra.mxu1 %v667_v58  ;;  %v563_v60 = vpop.f32.mrf.mxu0  ;;  %1185 = vmatprep.mubr.msk.bf16.mxu1 %vm1295_vm0, %v1294_v0 }
 0x4e3   : > { %1195 = vmatprep.subr.bf16.mxu1 %v1294_v0 }
 0x4e4   : > { %v1170_v61 = vpop.f32.mrf.mxu0 }
 0x4e6   : > { %v1434_v62 = vpop.f32.mrf.mxu0 }
 0x4e8   : > { %v1181_v1 = vpop.f32.mrf.mxu0 }
 0x4e9   : > { %1186 = vmatmul.mubr.msk.bf16.vlgmr.msra.gmra.mxu1 %vm337_vm1, %v660_v63 }
 0x4ea   : > { %v656_v2 = vpop.f32.mrf.mxu0  ;;  %1197 = vmatprep.mubr.msk.bf16.mxu1 %vm1295_vm0, %v1294_v0  ;;  %1196 = vmatpush3.bf16.msra.mxu1 %v776_v32 }
 0x4eb   : > { %1207 = vmatprep.subr.bf16.mxu1 %v1294_v0 }
 0x4ec   : > { %v1182_v3 = vpop.f32.mrf.mxu0 }
 0x5a1   : > { %v1439_v4 = vpop.f32.mrf.mxu1 }
 0x5a3   : > { %v1175_v6 = vpop.f32.mrf.mxu1 }
 0x5a5   : > { %v610_v7 = vpop.f32.mrf.mxu1 }
 0x5a6   : > { %v987_v7 = vld [vmem:[%s321_s9] sm:$0xff] }
 0x5a7   : > { %v1176_v8 = vpop.f32.mrf.mxu1 }
 0x5a9   : > { %v703_v9 = vpop.f32.mrf.mxu1 }
 0x5aa   : > { %v709_v10 = vmul.f32 0.35355338, %v703_v9 }
 0x5ab   : > { %v1187_v11 = vpop.f32.mrf.mxu1 }
 0x5ac   : > { %v710_v13 = vadd.f32 %v709_v10, %v1383_v5 }
 0x5ad   : > { %v706_v14 = vpop.f32.mrf.mxu1 }
 0x5ae   : > { %v711_v15 = vsel %vm337_vm1, %v710_v13, -inf }
 0x5af   : > { %712 = vmax.xlane.f32.xlu1 %v711_v15  ;;  %v1188_v16 = vpop.f32.mrf.mxu1 }
 0x5c0   : > { %723 = vrot.lane.b32.xlu1 %v1387_v12, %s1300_s18 }
 0x5c4   : > { %819 = vrot.lane.b32.xlu1 %v1394_v20, %s1301_s19 }
 0x638   : > { %v713_v17 = vpop.xlane.xlu1 %712 }
 0x639   : > { %v714_v18 = vsub.f32 %v710_v13, %v713_v17 }
 0x63b   : > { %v715_v19 = vmul.f32 1.442695, %v714_v18 }
 0x63c   : > { %v724_v23 = vpop.permute.xlu1 %723 }
 0x63d   : > { %1262 = vpow2.f32 %v715_v19  ;;  %v729_v24 = vsel %vm406_vm2, %v724_v23, 0 }
 0x63e   : > { %1190 = vmatpush3.bf16.msra.mxu0 %v729_v24 }
 0x63f   : > { %1201 = vmatprep.subr.bf16.mxu0 %v1294_v0 }
 0x640   : > { %v820_v30 = vpop.permute.xlu1 %819 }
 0x64a   : > { %v1263_v21 = vpop.eup %1262 }
 0x64b   : > { %v717_v22 = vsel %vm337_vm1, %v1263_v21, 0.0 }
 0x64c   : > { %718 = vadd.xlane.f32.xlu0 %v717_v22 }
 0x662   : > { %821 = vrot.lane.b32.xlu0 %v1387_v12, %s1301_s19 }
 0x6d5   : > { %v719_v25 = vpop.xlane.xlu0 %718 }
 0x6d6   : > { %1264 = vrcp.f32 %v719_v25 }
 0x6d9   : > { %v822_v20 = vpop.permute.xlu0 %821 }
 0x6da   : > { %v827_v28 = vsel %vm337_vm1, %v822_v20, 0 }
 0x6e3   : > { %v1265_v26 = vpop.eup %1264 }
 0x6e4   : > { %v721_v27 = vmul.f32 %v1265_v26, %v1263_v21 }
 0x6e6   : > { %v722_v29 = vpack.c.bf16 %v721_v27, %v721_v27 }
 0x6e8   : > { %1192 = vmatmul.mubr.msk.bf16.vlgmr.msra.gmra.mxu0 %vm337_vm1, %v722_v29 }
 0x6e9   : > { %1202 = vmatpush3.bf16.xpose.msra.mxu0 %v827_v28  ;;  %1203 = vmatprep.mubr.msk.bf16.mxu0 %vm1295_vm0, %v1294_v0 }
 0x6ea   : > { %1213 = vmatprep.subr.bf16.mxu0 %v1294_v0 }
 0x6f0   : > { %1204 = vmatmul.mubr.msk.bf16.vlgmr.msra.gmra.mxu0 %vm337_vm1, %v820_v30 }
 0x6f1   : > { %1215 = vmatprep.mubr.msk.bf16.mxu0 %vm1295_vm0, %v1294_v0 }
 0x7a8   : > { %v765_v33 = vpop.f32.mrf.mxu0 }
 0x7a9   : > { %v771_v34 = vpack.c.bf16 %v765_v33, %v765_v33 }
 0x7aa   : > { %v1193_v35 = vpop.f32.mrf.mxu0 }
 0x7ab   : > { %1198 = vmatmul.mubr.msk.bf16.vlgmr.msra.gmra.mxu1 %vm337_vm1, %v771_v34 }
 0x7ac   : > { %v768_v36 = vpop.f32.mrf.mxu0  ;;  %1209 = vmatprep.mubr.msk.bf16.mxu1 %vm1295_vm0, %v1294_v0 }
 0x7ae   : > { %v1194_v37 = vpop.f32.mrf.mxu0 }
 0x7b0   : > { %v863_v38 = vpop.f32.mrf.mxu0 }
 0x7b1   : > { %v869_v39 = vmul.f32 0.35355338, %v863_v38 }
 0x7b2   : > { %v1205_v40 = vpop.f32.mrf.mxu0 }
 0x7b3   : > { %v870_v41 = vadd.f32 %v869_v39, %v1383_v5  ;;  %v654_v5 = vadd.f32 %v1434_v62, %v1439_v4  ;;  %v1120_v4 = vld [vmem:[%s1503_s5] ss:$0 sm:$0xff] }
 0x7b4   : > { %v866_v42 = vpop.f32.mrf.mxu0 }
 0x7b5   : > { %v871_v43 = vsel %vm337_vm1, %v870_v41, -inf }
 0x7b6   : > { %872 = vmax.xlane.f32.xlu1 %v871_v43  ;;  %v1206_v44 = vpop.f32.mrf.mxu0 }
 0x7c7   : > { %883 = vrot.lane.b32.xlu1 %v1387_v12, %s1302_s27  ;;  %v336_v12 = vld [vmem:[%s1502_s4 + $0xc] sm:$0xf] }
 0x7c8   : > { %v936_v55 = vsel %vm406_vm2, %v336_v12, 0 }
 0x7c9   : > { %1214 = vmatpush3.bf16.msra.mxu0 %v936_v55 }
 0x83f   : > { %v873_v45 = vpop.xlane.xlu1 %872 }
 0x840   : > { %v874_v46 = vsub.f32 %v870_v41, %v873_v45 }
 0x842   : > { %v875_v47 = vmul.f32 1.442695, %v874_v46 }
 0x843   : > { %v884_v49 = vpop.permute.xlu1 %883 }
 0x844   : > { %1266 = vpow2.f32 %v875_v47  ;;  %v889_v50 = vsel %vm406_vm2, %v884_v49, 0 }
 0x845   : > { %1208 = vmatpush3.bf16.msra.mxu1 %v889_v50 }
 0x851   : > { %v1267_v48 = vpop.eup %1266 }
 0x852   : > { %v877_v0 = vsel %vm337_vm1, %v1267_v48, 0.0 }
 0x853   : > { %878 = vadd.xlane.f32.xlu0 %v877_v0 }
 0x86b   : > { %v812_v51 = vpop.f32.mrf.mxu1 }
 0x86c   : > { %v818_v52 = vadd.f32 %v812_v51, %v654_v5 }
 0x86d   : > { %v1199_v53 = vpop.f32.mrf.mxu1 }
 0x86f   : > { %v815_v54 = vpop.f32.mrf.mxu1 }
 0x871   : > { %v1200_v56 = vpop.f32.mrf.mxu1 }
 0x8dc   : > { %v879_v57 = vpop.xlane.xlu0 %878 }
 0x8dd   : > { %1268 = vrcp.f32 %v879_v57 }
 0x8ea   : > { %v1269_v58 = vpop.eup %1268 }
 0x8eb   : > { %v881_v59 = vmul.f32 %v1269_v58, %v1267_v48 }
 0x8ed   : > { %v882_v60 = vpack.c.bf16 %v881_v59, %v881_v59 }
 0x8ef   : > { %1210 = vmatmul.mubr.msk.bf16.vlgmr.msra.gmra.mxu1 %vm337_vm1, %v882_v60 }
 0x9af   : > { %v925_v61 = vpop.f32.mrf.mxu1 }
 0x9b0   : > { %v931_v62 = vpack.c.bf16 %v925_v61, %v925_v61 }
 0x9b1   : > { %v1211_v63 = vpop.f32.mrf.mxu1 }
 0x9b2   : > { %1216 = vmatmul.mubr.msk.bf16.vlgmr.msra.gmra.mxu0 %vm337_vm1, %v931_v62 }
 0x9b3   : > { %v928_v1 = vpop.f32.mrf.mxu1 }
 0x9b5   : > { %v1212_v2 = vpop.f32.mrf.mxu1 }
 0xa72   : > { %v972_v3 = vpop.f32.mrf.mxu0 }
 0xa73   : > { %v978_v6 = vadd.f32 %v972_v3, %v818_v52 }
 0xa74   : > { %v1217_v8 = vpop.f32.mrf.mxu0 }
 0xa75   : > { %v986_v9 = vadd.f32 %v1120_v4, %v978_v6 }
 0xa76   : > { %v975_v10 = vpop.f32.mrf.mxu0 }
 0xa77   : > { %v988_v11 = vadd.f32 %v987_v7, %v986_v9 }
 0xa78   : > { %v1218_v13 = vpop.f32.mrf.mxu0 }
 0xa79   : > { %v989_v14 = vpack.c.bf16 %v988_v11, %v988_v11 }
 0xa7b   : > { %991 = vst.msk [vmem:[%s327_s14] sm:$0xf] %vm990_vm3, %v989_v14 }
 0xa7c PF: > { %s16_s23 = sadd.s32 1, %s1292_s23   ;;  %s1505_s21 = smov %s1288_s22 }
 0xa7d   : > { %p13_p5 = scmp.ge.s32.totalorder %s16_s23, 4   ;;  %s1506_s22 = smov %s1508_s24 }
 0xa7f   :  { %15 = sbr.rel (!%p13_p5) target bundleno = 2 (0x2), region = 83 }

</bundles_post_ra>
